<compile_context>
chip_gen: v7x
topology: tpu7x:2x2x1
jax: 0.10.0
libtpu: 0.0.40
codegen_flags: <defaults>
</compile_context>

<pallas_src>
import functools

import jax
import jax.numpy as jnp
from jax import lax
from jax.experimental import pallas as pl
from jax.experimental.pallas import tpu as pltpu


def _round_up(x, m):
    return ((x + m - 1) // m) * m


def _slayer_net_kernel(x_ref, w_ref, o_ref, act_ref, wsum_ref,
                       *, theta, alpha_i, alpha_v, num_layers):
    """Fused SLAYER forward for one batch block.

    x_ref:    (T, BB, C)    input spikes, bf16, time-major, zero-padded
    w_ref:    (L, C, C)     stacked zero-padded dense weights, bf16
    o_ref:    (T, BB, C)    output spikes (already delay-shifted by 1), bf16
    act_ref:  (T, BB, C)    f32 VMEM scratch: current layer's input/output spikes
    wsum_ref: (T, BB, C)    f32 VMEM scratch: weighted (synaptic) input
    """
    T, BB, C = wsum_ref.shape

    # Load the (padded) input spike block once; activations stay in VMEM after this.
    act_ref[...] = x_ref[...].astype(jnp.float32)

    zero_state = jnp.zeros((BB, C), jnp.float32)

    for l in range(num_layers):  # static unroll over layers (L is small)
        # Dense layer: flatten (T, BB) -> M so the MXU sees one (T*BB, C) @ (C, C) pass.
        a = act_ref[...].reshape(T * BB, C).astype(jnp.bfloat16)
        wsum = jnp.dot(a, w_ref[l], preferred_element_type=jnp.float32)
        wsum_ref[...] = wsum.reshape(T, BB, C)

        # delayShift by 1: output at t=0 is zero; out[t] = spike[t-1]; spike[T-1] is dropped.
        act_ref[0] = jnp.zeros((BB, C), jnp.float32)

        def step(t, carry):
            u, v = carry
            u = alpha_i * u + wsum_ref[t]          # CUBA current, full (BB, C) tile
            v = alpha_v * v + u                    # membrane voltage
            spiked = v >= theta
            v = jnp.where(spiked, 0.0, v)          # reset on spike
            act_ref[t + 1] = spiked.astype(jnp.float32)  # aligned full-tile store
            return (u, v)

        lax.fori_loop(0, T - 1, step, (zero_state, zero_state), unroll=True)

    o_ref[...] = act_ref[...].astype(o_ref.dtype)


def slayer_forward(x, w_stack, *, theta, alpha_i, alpha_v, out_dim, bblk=8):
    """Run the full fused SLAYER network.

    x:       (B, T, Cin) f32 binary spike trains
    w_stack: (L, Cpad, Cpad) bf16 zero-padded stacked dense weights
    returns: (B, T, out_dim) f32 output spikes
    """
    B, T, cin = x.shape
    L, cpad, _ = w_stack.shape
    b_pad = _round_up(max(B, bblk), bblk)

    # Time-major, batch- and feature-padded, bf16 (spikes are 0/1 -> lossless).
    xt = jnp.zeros((T, b_pad, cpad), jnp.bfloat16)
    xt = xt.at[:, :B, :cin].set(jnp.transpose(x, (1, 0, 2)).astype(jnp.bfloat16))

    kernel = functools.partial(
        _slayer_net_kernel,
        theta=theta, alpha_i=alpha_i, alpha_v=alpha_v, num_layers=L,
    )

    out_tm = pl.pallas_call(
        kernel,
        out_shape=jax.ShapeDtypeStruct((T, b_pad, cpad), jnp.bfloat16),
        grid_spec=pltpu.PrefetchScalarGridSpec(
            num_scalar_prefetch=0,
            grid=(b_pad // bblk,),
            in_specs=[
                pl.BlockSpec((T, bblk, cpad), lambda b: (0, b, 0)),
                pl.BlockSpec((L, cpad, cpad), lambda b: (0, 0, 0)),
            ],
            out_specs=pl.BlockSpec((T, bblk, cpad), lambda b: (0, b, 0)),
            scratch_shapes=[
                pltpu.VMEM((T, bblk, cpad), jnp.float32),  # activations
                pltpu.VMEM((T, bblk, cpad), jnp.float32),  # weighted sums
            ],
        ),
        compiler_params=pltpu.CompilerParams(
            dimension_semantics=("parallel",),
        ),
    )(xt, w_stack)

    # Back to (B, T, Cout) f32, dropping padding.
    return jnp.transpose(out_tm, (1, 0, 2))[:B, :, :out_dim].astype(jnp.float32)


class SLAYERPallas:
    """JAX/Pallas counterpart of the PyTorch SLAYER module (fused forward)."""

    def __init__(self, inp_dim, out_dim, params, key, bblk=8):
        neuron = params["neuron"]
        self.theta = float(neuron["theta"])
        self.alpha_i = float((4096.0 - neuron["iDecay"]) / 4096.0)
        self.alpha_v = float((4096.0 - neuron["vDecay"]) / 4096.0)
        self.out_dim = int(out_dim)
        self.bblk = int(bblk)

        layer_sizes = [int(h["dim"]) for h in params["hidden"]] + [int(out_dim)]

        # One shared padded channel width so the whole stack fuses into one kernel
        # with a single in-place activation buffer.  Padded to 128 lanes (lane-dense).
        self.cpad = _round_up(max([int(inp_dim)] + layer_sizes), 128)

        self.weights = []          # unpadded bf16 weights (used by the reference)
        padded = []
        in_size = int(inp_dim)
        for n in layer_sizes:
            key, sub = jax.random.split(key)
            # Deterministic synthetic init (slayer uses scaled-normal conv weights).
            w = (jax.random.normal(sub, (in_size, n), dtype=jnp.float32)
                 * (2.0 / jnp.sqrt(in_size))).astype(jnp.bfloat16)
            self.weights.append(w)
            wp = jnp.zeros((self.cpad, self.cpad), jnp.bfloat16)
            wp = wp.at[:in_size, :n].set(w)       # padded rows/cols are zero -> exact
            padded.append(wp)
            in_size = n
        self.w_stack = jnp.stack(padded)          # (L, Cpad, Cpad) bf16

    def __call__(self, spikes):
        return slayer_forward(
            spikes, self.w_stack,
            theta=self.theta, alpha_i=self.alpha_i, alpha_v=self.alpha_v,
            out_dim=self.out_dim, bblk=self.bblk,
        )


def _reference_forward(x, weights, theta, alpha_i, alpha_v):
    """Pure-JAX reference: per layer dense -> spikeLoihi -> delayShift(1)."""
    out = x
    for w in weights:
        wf = w.astype(jnp.float32)
        B, T, _ = out.shape
        cout = wf.shape[1]
        weighted = jnp.einsum("btc,co->bto", out, wf)
        u = jnp.zeros((B, cout), jnp.float32)
        v = jnp.zeros((B, cout), jnp.float32)
        spikes = [jnp.zeros((B, cout), jnp.float32)]
        for t in range(T):
            u = alpha_i * u + weighted[:, t]
            v = alpha_v * v + u
            spiked = v >= theta
            v = jnp.where(spiked, 0.0, v)
            spikes.append(spiked.astype(jnp.float32))
        out = jnp.stack(spikes[:T], axis=1)       # delay-shifted by 1
    return out


if __name__ == "__main__":
    key = jax.random.PRNGKey(0)

    # Small shapes consistent with the module: dense SNN over time.
    B, T = 2, 8
    inp_dim, out_dim = 16, 8
    params = {
        "neuron": {"theta": 1.25, "iDecay": 1024, "vDecay": 128, "refDelay": 1, "wgtExp": 0},
        "simulation": {"Ts": 1, "tSample": T},
        "hidden": [{"dim": 32}, {"dim": 32}],
    }

    key, k_in, k_net = jax.random.split(key, 3)
    # Binary input spike trains, layout (B, T, C).
    spikes_in = jax.random.bernoulli(k_in, p=0.3, shape=(B, T, inp_dim)).astype(jnp.float32)

    net = SLAYERPallas(inp_dim, out_dim, params, k_net)

    out = net(spikes_in)
    out = jax.block_until_ready(out)
    assert out.shape == (B, T, out_dim), out.shape

    # Pure-JAX reference of the full forward pass with the same bf16 weights.
    ref = _reference_forward(spikes_in, net.weights, net.theta, net.alpha_i, net.alpha_v)
    # Spikes are binary; allow a negligible mismatch fraction from accumulation-order
    # rounding near the threshold.
    mismatch = float(jnp.mean(jnp.abs(out - ref)))
    assert mismatch < 0.02, f"mismatch fraction too high: {mismatch}"

    print("KERNEL_OK")
</pallas_src>

<mosaic_0001>
module attributes {stable_mosaic.version = 11 : i64} {
  func.func @_slayer_net_kernel(%arg0: i32, %arg1: memref<8x8x128xbf16, #tpu.memory_space<vmem>>, %arg2: memref<3x128x128xbf16, #tpu.memory_space<vmem>>, %arg3: memref<8x8x128xbf16, #tpu.memory_space<vmem>>, %arg4: memref<8x8x128xf32, #tpu.memory_space<vmem>>, %arg5: memref<8x8x128xf32, #tpu.memory_space<vmem>>) attributes {dimension_semantics = [#tpu.dimension_semantics<parallel>], iteration_bounds = array<i64: 1>, scalar_prefetch = 0 : i64, scratch_operands = 2 : i64, tpu.core_type = #tpu.core_type<tc>, window_params = [{transform_indices = @transform_0, window_bounds = array<i64: 8, 8, 128>}, {pipeline_mode = #tpu.pipeline_mode<synchronous>, transform_indices = @transform_1, window_bounds = array<i64: 3, 128, 128>}, {transform_indices = @transform_2, window_bounds = array<i64: 8, 8, 128>}]} {
    %c0 = arith.constant 0 : index
    %c0_0 = arith.constant 0 : index
    %c0_1 = arith.constant 0 : index
    %0 = vector.load %arg1[%c0, %c0_0, %c0_1] : memref<8x8x128xbf16, #tpu.memory_space<vmem>>, vector<8x8x128xbf16>
    %1 = arith.extf %0 : vector<8x8x128xbf16> to vector<8x8x128xf32>
    %c0_2 = arith.constant 0 : index
    %c0_3 = arith.constant 0 : index
    %c0_4 = arith.constant 0 : index
    %2 = vector.load %arg4[%c0_2, %c0_3, %c0_4] : memref<8x8x128xf32, #tpu.memory_space<vmem>>, vector<8x8x128xf32>
    tpu.vector_store %arg4[%c0_2, %c0_3, %c0_4], %1 {strides = array<i32>} : memref<8x8x128xf32, #tpu.memory_space<vmem>>, vector<8x8x128xf32>,
    %cst = arith.constant 0.000000e+00 : f32
    %3 = vector.broadcast %cst : f32 to vector<8x128xf32>
    %c0_5 = arith.constant 0 : index
    %c0_6 = arith.constant 0 : index
    %c0_7 = arith.constant 0 : index
    %4 = vector.load %arg4[%c0_5, %c0_6, %c0_7] : memref<8x8x128xf32, #tpu.memory_space<vmem>>, vector<8x8x128xf32>
    %5 = vector.shape_cast %4 : vector<8x8x128xf32> to vector<64x128xf32>
    %6 = arith.truncf %5 : vector<64x128xf32> to vector<64x128xbf16>
    %c0_8 = arith.constant 0 : index
    %c0_9 = arith.constant 0 : index
    %c0_10 = arith.constant 0 : index
    %7 = vector.load %arg2[%c0_8, %c0_9, %c0_10] : memref<3x128x128xbf16, #tpu.memory_space<vmem>>, vector<1x128x128xbf16>
    %8 = vector.shape_cast %7 : vector<1x128x128xbf16> to vector<128x128xbf16>
    %cst_11 = arith.constant dense<0.000000e+00> : vector<64x128xf32>
    %9 = tpu.matmul %6, %8, %cst_11 {dimension_numbers = #tpu.dot_dimension_numbers<[1], [0], [0], [1], [0, 0, 1, 1], [], []>} : vector<64x128xbf16>, vector<128x128xbf16>, vector<64x128xf32> -> vector<64x128xf32>
    %10 = vector.shape_cast %9 : vector<64x128xf32> to vector<8x8x128xf32>
    %c0_12 = arith.constant 0 : index
    %c0_13 = arith.constant 0 : index
    %c0_14 = arith.constant 0 : index
    %11 = vector.load %arg5[%c0_12, %c0_13, %c0_14] : memref<8x8x128xf32, #tpu.memory_space<vmem>>, vector<8x8x128xf32>
    tpu.vector_store %arg5[%c0_12, %c0_13, %c0_14], %10 {strides = array<i32>} : memref<8x8x128xf32, #tpu.memory_space<vmem>>, vector<8x8x128xf32>,
    %cst_15 = arith.constant 0.000000e+00 : f32
    %12 = vector.broadcast %cst_15 : f32 to vector<8x128xf32>
    %c0_16 = arith.constant 0 : index
    %c0_17 = arith.constant 0 : index
    %c0_18 = arith.constant 0 : index
    %13 = vector.load %arg4[%c0_16, %c0_17, %c0_18] : memref<8x8x128xf32, #tpu.memory_space<vmem>>, vector<1x8x128xf32>
    %14 = vector.shape_cast %13 : vector<1x8x128xf32> to vector<8x128xf32>
    %15 = vector.shape_cast %12 : vector<8x128xf32> to vector<1x8x128xf32>
    tpu.vector_store %arg4[%c0_16, %c0_17, %c0_18], %15 {strides = array<i32>} : memref<8x8x128xf32, #tpu.memory_space<vmem>>, vector<1x8x128xf32>,
    %c0_i32 = arith.constant 0 : i32
    %cst_19 = arith.constant 7.500000e-01 : f32
    %16 = vector.broadcast %cst_19 : f32 to vector<8x128xf32>
    %17 = arith.mulf %16, %3 : vector<8x128xf32>
    %18 = arith.index_cast %c0_i32 : i32 to index
    %c0_20 = arith.constant 0 : index
    %c0_21 = arith.constant 0 : index
    %19 = vector.load %arg5[%18, %c0_20, %c0_21] : memref<8x8x128xf32, #tpu.memory_space<vmem>>, vector<1x8x128xf32>
    %20 = vector.shape_cast %19 : vector<1x8x128xf32> to vector<8x128xf32>
    %21 = arith.addf %17, %20 : vector<8x128xf32>
    %cst_22 = arith.constant 9.687500e-01 : f32
    %22 = vector.broadcast %cst_22 : f32 to vector<8x128xf32>
    %23 = arith.mulf %22, %3 : vector<8x128xf32>
    %24 = arith.addf %23, %21 : vector<8x128xf32>
    %cst_23 = arith.constant 1.250000e+00 : f32
    %25 = vector.broadcast %cst_23 : f32 to vector<8x128xf32>
    %26 = arith.cmpf oge, %24, %25 : vector<8x128xf32>
    %cst_24 = arith.constant 0.000000e+00 : f32
    %27 = vector.broadcast %cst_24 : f32 to vector<8x128xf32>
    %28 = arith.select %26, %27, %24 : vector<8x128xi1>, vector<8x128xf32>
    %29 = arith.extui %26 : vector<8x128xi1> to vector<8x128xi32>
    %30 = arith.sitofp %29 : vector<8x128xi32> to vector<8x128xf32>
    %c1_i32 = arith.constant 1 : i32
    %31 = arith.addi %c0_i32, %c1_i32 : i32
    %32 = arith.index_cast %31 : i32 to index
    %c0_25 = arith.constant 0 : index
    %c0_26 = arith.constant 0 : index
    %33 = vector.load %arg4[%32, %c0_25, %c0_26] : memref<8x8x128xf32, #tpu.memory_space<vmem>>, vector<1x8x128xf32>
    %34 = vector.shape_cast %33 : vector<1x8x128xf32> to vector<8x128xf32>
    %35 = vector.shape_cast %30 : vector<8x128xf32> to vector<1x8x128xf32>
    tpu.vector_store %arg4[%32, %c0_25, %c0_26], %35 {strides = array<i32>} : memref<8x8x128xf32, #tpu.memory_space<vmem>>, vector<1x8x128xf32>,
    %c1_i32_27 = arith.constant 1 : i32
    %cst_28 = arith.constant 7.500000e-01 : f32
    %36 = vector.broadcast %cst_28 : f32 to vector<8x128xf32>
    %37 = arith.mulf %36, %21 : vector<8x128xf32>
    %38 = arith.index_cast %c1_i32_27 : i32 to index
    %c0_29 = arith.constant 0 : index
    %c0_30 = arith.constant 0 : index
    %39 = vector.load %arg5[%38, %c0_29, %c0_30] : memref<8x8x128xf32, #tpu.memory_space<vmem>>, vector<1x8x128xf32>
    %40 = vector.shape_cast %39 : vector<1x8x128xf32> to vector<8x128xf32>
    %41 = arith.addf %37, %40 : vector<8x128xf32>
    %cst_31 = arith.constant 9.687500e-01 : f32
    %42 = vector.broadcast %cst_31 : f32 to vector<8x128xf32>
    %43 = arith.mulf %42, %28 : vector<8x128xf32>
    %44 = arith.addf %43, %41 : vector<8x128xf32>
    %cst_32 = arith.constant 1.250000e+00 : f32
    %45 = vector.broadcast %cst_32 : f32 to vector<8x128xf32>
    %46 = arith.cmpf oge, %44, %45 : vector<8x128xf32>
    %cst_33 = arith.constant 0.000000e+00 : f32
    %47 = vector.broadcast %cst_33 : f32 to vector<8x128xf32>
    %48 = arith.select %46, %47, %44 : vector<8x128xi1>, vector<8x128xf32>
    %49 = arith.extui %46 : vector<8x128xi1> to vector<8x128xi32>
    %50 = arith.sitofp %49 : vector<8x128xi32> to vector<8x128xf32>
    %c1_i32_34 = arith.constant 1 : i32
    %51 = arith.addi %c1_i32_27, %c1_i32_34 : i32
    %52 = arith.index_cast %51 : i32 to index
    %c0_35 = arith.constant 0 : index
    %c0_36 = arith.constant 0 : index
    %53 = vector.load %arg4[%52, %c0_35, %c0_36] : memref<8x8x128xf32, #tpu.memory_space<vmem>>, vector<1x8x128xf32>
    %54 = vector.shape_cast %53 : vector<1x8x128xf32> to vector<8x128xf32>
    %55 = vector.shape_cast %50 : vector<8x128xf32> to vector<1x8x128xf32>
    tpu.vector_store %arg4[%52, %c0_35, %c0_36], %55 {strides = array<i32>} : memref<8x8x128xf32, #tpu.memory_space<vmem>>, vector<1x8x128xf32>,
    %c2_i32 = arith.constant 2 : i32
    %cst_37 = arith.constant 7.500000e-01 : f32
    %56 = vector.broadcast %cst_37 : f32 to vector<8x128xf32>
    %57 = arith.mulf %56, %41 : vector<8x128xf32>
    %58 = arith.index_cast %c2_i32 : i32 to index
    %c0_38 = arith.constant 0 : index
    %c0_39 = arith.constant 0 : index
    %59 = vector.load %arg5[%58, %c0_38, %c0_39] : memref<8x8x128xf32, #tpu.memory_space<vmem>>, vector<1x8x128xf32>
    %60 = vector.shape_cast %59 : vector<1x8x128xf32> to vector<8x128xf32>
    %61 = arith.addf %57, %60 : vector<8x128xf32>
    %cst_40 = arith.constant 9.687500e-01 : f32
    %62 = vector.broadcast %cst_40 : f32 to vector<8x128xf32>
    %63 = arith.mulf %62, %48 : vector<8x128xf32>
    %64 = arith.addf %63, %61 : vector<8x128xf32>
    %cst_41 = arith.constant 1.250000e+00 : f32
    %65 = vector.broadcast %cst_41 : f32 to vector<8x128xf32>
    %66 = arith.cmpf oge, %64, %65 : vector<8x128xf32>
    %cst_42 = arith.constant 0.000000e+00 : f32
    %67 = vector.broadcast %cst_42 : f32 to vector<8x128xf32>
    %68 = arith.select %66, %67, %64 : vector<8x128xi1>, vector<8x128xf32>
    %69 = arith.extui %66 : vector<8x128xi1> to vector<8x128xi32>
    %70 = arith.sitofp %69 : vector<8x128xi32> to vector<8x128xf32>
    %c1_i32_43 = arith.constant 1 : i32
    %71 = arith.addi %c2_i32, %c1_i32_43 : i32
    %72 = arith.index_cast %71 : i32 to index
    %c0_44 = arith.constant 0 : index
    %c0_45 = arith.constant 0 : index
    %73 = vector.load %arg4[%72, %c0_44, %c0_45] : memref<8x8x128xf32, #tpu.memory_space<vmem>>, vector<1x8x128xf32>
    %74 = vector.shape_cast %73 : vector<1x8x128xf32> to vector<8x128xf32>
    %75 = vector.shape_cast %70 : vector<8x128xf32> to vector<1x8x128xf32>
    tpu.vector_store %arg4[%72, %c0_44, %c0_45], %75 {strides = array<i32>} : memref<8x8x128xf32, #tpu.memory_space<vmem>>, vector<1x8x128xf32>,
    %c3_i32 = arith.constant 3 : i32
    %cst_46 = arith.constant 7.500000e-01 : f32
    %76 = vector.broadcast %cst_46 : f32 to vector<8x128xf32>
    %77 = arith.mulf %76, %61 : vector<8x128xf32>
    %78 = arith.index_cast %c3_i32 : i32 to index
    %c0_47 = arith.constant 0 : index
    %c0_48 = arith.constant 0 : index
    %79 = vector.load %arg5[%78, %c0_47, %c0_48] : memref<8x8x128xf32, #tpu.memory_space<vmem>>, vector<1x8x128xf32>
    %80 = vector.shape_cast %79 : vector<1x8x128xf32> to vector<8x128xf32>
    %81 = arith.addf %77, %80 : vector<8x128xf32>
    %cst_49 = arith.constant 9.687500e-01 : f32
    %82 = vector.broadcast %cst_49 : f32 to vector<8x128xf32>
    %83 = arith.mulf %82, %68 : vector<8x128xf32>
    %84 = arith.addf %83, %81 : vector<8x128xf32>
    %cst_50 = arith.constant 1.250000e+00 : f32
    %85 = vector.broadcast %cst_50 : f32 to vector<8x128xf32>
    %86 = arith.cmpf oge, %84, %85 : vector<8x128xf32>
    %cst_51 = arith.constant 0.000000e+00 : f32
    %87 = vector.broadcast %cst_51 : f32 to vector<8x128xf32>
    %88 = arith.select %86, %87, %84 : vector<8x128xi1>, vector<8x128xf32>
    %89 = arith.extui %86 : vector<8x128xi1> to vector<8x128xi32>
    %90 = arith.sitofp %89 : vector<8x128xi32> to vector<8x128xf32>
    %c1_i32_52 = arith.constant 1 : i32
    %91 = arith.addi %c3_i32, %c1_i32_52 : i32
    %92 = arith.index_cast %91 : i32 to index
    %c0_53 = arith.constant 0 : index
    %c0_54 = arith.constant 0 : index
    %93 = vector.load %arg4[%92, %c0_53, %c0_54] : memref<8x8x128xf32, #tpu.memory_space<vmem>>, vector<1x8x128xf32>
    %94 = vector.shape_cast %93 : vector<1x8x128xf32> to vector<8x128xf32>
    %95 = vector.shape_cast %90 : vector<8x128xf32> to vector<1x8x128xf32>
    tpu.vector_store %arg4[%92, %c0_53, %c0_54], %95 {strides = array<i32>} : memref<8x8x128xf32, #tpu.memory_space<vmem>>, vector<1x8x128xf32>,
    %c4_i32 = arith.constant 4 : i32
    %cst_55 = arith.constant 7.500000e-01 : f32
    %96 = vector.broadcast %cst_55 : f32 to vector<8x128xf32>
    %97 = arith.mulf %96, %81 : vector<8x128xf32>
    %98 = arith.index_cast %c4_i32 : i32 to index
    %c0_56 = arith.constant 0 : index
    %c0_57 = arith.constant 0 : index
    %99 = vector.load %arg5[%98, %c0_56, %c0_57] : memref<8x8x128xf32, #tpu.memory_space<vmem>>, vector<1x8x128xf32>
    %100 = vector.shape_cast %99 : vector<1x8x128xf32> to vector<8x128xf32>
    %101 = arith.addf %97, %100 : vector<8x128xf32>
    %cst_58 = arith.constant 9.687500e-01 : f32
    %102 = vector.broadcast %cst_58 : f32 to vector<8x128xf32>
    %103 = arith.mulf %102, %88 : vector<8x128xf32>
    %104 = arith.addf %103, %101 : vector<8x128xf32>
    %cst_59 = arith.constant 1.250000e+00 : f32
    %105 = vector.broadcast %cst_59 : f32 to vector<8x128xf32>
    %106 = arith.cmpf oge, %104, %105 : vector<8x128xf32>
    %cst_60 = arith.constant 0.000000e+00 : f32
    %107 = vector.broadcast %cst_60 : f32 to vector<8x128xf32>
    %108 = arith.select %106, %107, %104 : vector<8x128xi1>, vector<8x128xf32>
    %109 = arith.extui %106 : vector<8x128xi1> to vector<8x128xi32>
    %110 = arith.sitofp %109 : vector<8x128xi32> to vector<8x128xf32>
    %c1_i32_61 = arith.constant 1 : i32
    %111 = arith.addi %c4_i32, %c1_i32_61 : i32
    %112 = arith.index_cast %111 : i32 to index
    %c0_62 = arith.constant 0 : index
    %c0_63 = arith.constant 0 : index
    %113 = vector.load %arg4[%112, %c0_62, %c0_63] : memref<8x8x128xf32, #tpu.memory_space<vmem>>, vector<1x8x128xf32>
    %114 = vector.shape_cast %113 : vector<1x8x128xf32> to vector<8x128xf32>
    %115 = vector.shape_cast %110 : vector<8x128xf32> to vector<1x8x128xf32>
    tpu.vector_store %arg4[%112, %c0_62, %c0_63], %115 {strides = array<i32>} : memref<8x8x128xf32, #tpu.memory_space<vmem>>, vector<1x8x128xf32>,
    %c5_i32 = arith.constant 5 : i32
    %cst_64 = arith.constant 7.500000e-01 : f32
    %116 = vector.broadcast %cst_64 : f32 to vector<8x128xf32>
    %117 = arith.mulf %116, %101 : vector<8x128xf32>
    %118 = arith.index_cast %c5_i32 : i32 to index
    %c0_65 = arith.constant 0 : index
    %c0_66 = arith.constant 0 : index
    %119 = vector.load %arg5[%118, %c0_65, %c0_66] : memref<8x8x128xf32, #tpu.memory_space<vmem>>, vector<1x8x128xf32>
    %120 = vector.shape_cast %119 : vector<1x8x128xf32> to vector<8x128xf32>
    %121 = arith.addf %117, %120 : vector<8x128xf32>
    %cst_67 = arith.constant 9.687500e-01 : f32
    %122 = vector.broadcast %cst_67 : f32 to vector<8x128xf32>
    %123 = arith.mulf %122, %108 : vector<8x128xf32>
    %124 = arith.addf %123, %121 : vector<8x128xf32>
    %cst_68 = arith.constant 1.250000e+00 : f32
    %125 = vector.broadcast %cst_68 : f32 to vector<8x128xf32>
    %126 = arith.cmpf oge, %124, %125 : vector<8x128xf32>
    %cst_69 = arith.constant 0.000000e+00 : f32
    %127 = vector.broadcast %cst_69 : f32 to vector<8x128xf32>
    %128 = arith.select %126, %127, %124 : vector<8x128xi1>, vector<8x128xf32>
    %129 = arith.extui %126 : vector<8x128xi1> to vector<8x128xi32>
    %130 = arith.sitofp %129 : vector<8x128xi32> to vector<8x128xf32>
    %c1_i32_70 = arith.constant 1 : i32
    %131 = arith.addi %c5_i32, %c1_i32_70 : i32
    %132 = arith.index_cast %131 : i32 to index
    %c0_71 = arith.constant 0 : index
    %c0_72 = arith.constant 0 : index
    %133 = vector.load %arg4[%132, %c0_71, %c0_72] : memref<8x8x128xf32, #tpu.memory_space<vmem>>, vector<1x8x128xf32>
    %134 = vector.shape_cast %133 : vector<1x8x128xf32> to vector<8x128xf32>
    %135 = vector.shape_cast %130 : vector<8x128xf32> to vector<1x8x128xf32>
    tpu.vector_store %arg4[%132, %c0_71, %c0_72], %135 {strides = array<i32>} : memref<8x8x128xf32, #tpu.memory_space<vmem>>, vector<1x8x128xf32>,
    %c6_i32 = arith.constant 6 : i32
    %cst_73 = arith.constant 7.500000e-01 : f32
    %136 = vector.broadcast %cst_73 : f32 to vector<8x128xf32>
    %137 = arith.mulf %136, %121 : vector<8x128xf32>
    %138 = arith.index_cast %c6_i32 : i32 to index
    %c0_74 = arith.constant 0 : index
    %c0_75 = arith.constant 0 : index
    %139 = vector.load %arg5[%138, %c0_74, %c0_75] : memref<8x8x128xf32, #tpu.memory_space<vmem>>, vector<1x8x128xf32>
    %140 = vector.shape_cast %139 : vector<1x8x128xf32> to vector<8x128xf32>
    %141 = arith.addf %137, %140 : vector<8x128xf32>
    %cst_76 = arith.constant 9.687500e-01 : f32
    %142 = vector.broadcast %cst_76 : f32 to vector<8x128xf32>
    %143 = arith.mulf %142, %128 : vector<8x128xf32>
    %144 = arith.addf %143, %141 : vector<8x128xf32>
    %cst_77 = arith.constant 1.250000e+00 : f32
    %145 = vector.broadcast %cst_77 : f32 to vector<8x128xf32>
    %146 = arith.cmpf oge, %144, %145 : vector<8x128xf32>
    %cst_78 = arith.constant 0.000000e+00 : f32
    %147 = vector.broadcast %cst_78 : f32 to vector<8x128xf32>
    %148 = arith.select %146, %147, %144 : vector<8x128xi1>, vector<8x128xf32>
    %149 = arith.extui %146 : vector<8x128xi1> to vector<8x128xi32>
    %150 = arith.sitofp %149 : vector<8x128xi32> to vector<8x128xf32>
    %c1_i32_79 = arith.constant 1 : i32
    %151 = arith.addi %c6_i32, %c1_i32_79 : i32
    %152 = arith.index_cast %151 : i32 to index
    %c0_80 = arith.constant 0 : index
    %c0_81 = arith.constant 0 : index
    %153 = vector.load %arg4[%152, %c0_80, %c0_81] : memref<8x8x128xf32, #tpu.memory_space<vmem>>, vector<1x8x128xf32>
    %154 = vector.shape_cast %153 : vector<1x8x128xf32> to vector<8x128xf32>
    %155 = vector.shape_cast %150 : vector<8x128xf32> to vector<1x8x128xf32>
    tpu.vector_store %arg4[%152, %c0_80, %c0_81], %155 {strides = array<i32>} : memref<8x8x128xf32, #tpu.memory_space<vmem>>, vector<1x8x128xf32>,
    %c7_i32 = arith.constant 7 : i32
    %c0_82 = arith.constant 0 : index
    %c0_83 = arith.constant 0 : index
    %c0_84 = arith.constant 0 : index
    %156 = vector.load %arg4[%c0_82, %c0_83, %c0_84] : memref<8x8x128xf32, #tpu.memory_space<vmem>>, vector<8x8x128xf32>
    %157 = vector.shape_cast %156 : vector<8x8x128xf32> to vector<64x128xf32>
    %158 = arith.truncf %157 : vector<64x128xf32> to vector<64x128xbf16>
    %c1 = arith.constant 1 : index
    %c0_85 = arith.constant 0 : index
    %c0_86 = arith.constant 0 : index
    %159 = vector.load %arg2[%c1, %c0_85, %c0_86] : memref<3x128x128xbf16, #tpu.memory_space<vmem>>, vector<1x128x128xbf16>
    %160 = vector.shape_cast %159 : vector<1x128x128xbf16> to vector<128x128xbf16>
    %cst_87 = arith.constant dense<0.000000e+00> : vector<64x128xf32>
    %161 = tpu.matmul %158, %160, %cst_87 {dimension_numbers = #tpu.dot_dimension_numbers<[1], [0], [0], [1], [0, 0, 1, 1], [], []>} : vector<64x128xbf16>, vector<128x128xbf16>, vector<64x128xf32> -> vector<64x128xf32>
    %162 = vector.shape_cast %161 : vector<64x128xf32> to vector<8x8x128xf32>
    %c0_88 = arith.constant 0 : index
    %c0_89 = arith.constant 0 : index
    %c0_90 = arith.constant 0 : index
    %163 = vector.load %arg5[%c0_88, %c0_89, %c0_90] : memref<8x8x128xf32, #tpu.memory_space<vmem>>, vector<8x8x128xf32>
    tpu.vector_store %arg5[%c0_88, %c0_89, %c0_90], %162 {strides = array<i32>} : memref<8x8x128xf32, #tpu.memory_space<vmem>>, vector<8x8x128xf32>,
    %cst_91 = arith.constant 0.000000e+00 : f32
    %164 = vector.broadcast %cst_91 : f32 to vector<8x128xf32>
    %c0_92 = arith.constant 0 : index
    %c0_93 = arith.constant 0 : index
    %c0_94 = arith.constant 0 : index
    %165 = vector.load %arg4[%c0_92, %c0_93, %c0_94] : memref<8x8x128xf32, #tpu.memory_space<vmem>>, vector<1x8x128xf32>
    %166 = vector.shape_cast %165 : vector<1x8x128xf32> to vector<8x128xf32>
    %167 = vector.shape_cast %164 : vector<8x128xf32> to vector<1x8x128xf32>
    tpu.vector_store %arg4[%c0_92, %c0_93, %c0_94], %167 {strides = array<i32>} : memref<8x8x128xf32, #tpu.memory_space<vmem>>, vector<1x8x128xf32>,
    %c0_i32_95 = arith.constant 0 : i32
    %cst_96 = arith.constant 7.500000e-01 : f32
    %168 = vector.broadcast %cst_96 : f32 to vector<8x128xf32>
    %169 = arith.mulf %168, %3 : vector<8x128xf32>
    %170 = arith.index_cast %c0_i32_95 : i32 to index
    %c0_97 = arith.constant 0 : index
    %c0_98 = arith.constant 0 : index
    %171 = vector.load %arg5[%170, %c0_97, %c0_98] : memref<8x8x128xf32, #tpu.memory_space<vmem>>, vector<1x8x128xf32>
    %172 = vector.shape_cast %171 : vector<1x8x128xf32> to vector<8x128xf32>
    %173 = arith.addf %169, %172 : vector<8x128xf32>
    %cst_99 = arith.constant 9.687500e-01 : f32
    %174 = vector.broadcast %cst_99 : f32 to vector<8x128xf32>
    %175 = arith.mulf %174, %3 : vector<8x128xf32>
    %176 = arith.addf %175, %173 : vector<8x128xf32>
    %cst_100 = arith.constant 1.250000e+00 : f32
    %177 = vector.broadcast %cst_100 : f32 to vector<8x128xf32>
    %178 = arith.cmpf oge, %176, %177 : vector<8x128xf32>
    %cst_101 = arith.constant 0.000000e+00 : f32
    %179 = vector.broadcast %cst_101 : f32 to vector<8x128xf32>
    %180 = arith.select %178, %179, %176 : vector<8x128xi1>, vector<8x128xf32>
    %181 = arith.extui %178 : vector<8x128xi1> to vector<8x128xi32>
    %182 = arith.sitofp %181 : vector<8x128xi32> to vector<8x128xf32>
    %c1_i32_102 = arith.constant 1 : i32
    %183 = arith.addi %c0_i32_95, %c1_i32_102 : i32
    %184 = arith.index_cast %183 : i32 to index
    %c0_103 = arith.constant 0 : index
    %c0_104 = arith.constant 0 : index
    %185 = vector.load %arg4[%184, %c0_103, %c0_104] : memref<8x8x128xf32, #tpu.memory_space<vmem>>, vector<1x8x128xf32>
    %186 = vector.shape_cast %185 : vector<1x8x128xf32> to vector<8x128xf32>
    %187 = vector.shape_cast %182 : vector<8x128xf32> to vector<1x8x128xf32>
    tpu.vector_store %arg4[%184, %c0_103, %c0_104], %187 {strides = array<i32>} : memref<8x8x128xf32, #tpu.memory_space<vmem>>, vector<1x8x128xf32>,
    %c1_i32_105 = arith.constant 1 : i32
    %cst_106 = arith.constant 7.500000e-01 : f32
    %188 = vector.broadcast %cst_106 : f32 to vector<8x128xf32>
    %189 = arith.mulf %188, %173 : vector<8x128xf32>
    %190 = arith.index_cast %c1_i32_105 : i32 to index
    %c0_107 = arith.constant 0 : index
    %c0_108 = arith.constant 0 : index
    %191 = vector.load %arg5[%190, %c0_107, %c0_108] : memref<8x8x128xf32, #tpu.memory_space<vmem>>, vector<1x8x128xf32>
    %192 = vector.shape_cast %191 : vector<1x8x128xf32> to vector<8x128xf32>
    %193 = arith.addf %189, %192 : vector<8x128xf32>
    %cst_109 = arith.constant 9.687500e-01 : f32
    %194 = vector.broadcast %cst_109 : f32 to vector<8x128xf32>
    %195 = arith.mulf %194, %180 : vector<8x128xf32>
    %196 = arith.addf %195, %193 : vector<8x128xf32>
    %cst_110 = arith.constant 1.250000e+00 : f32
    %197 = vector.broadcast %cst_110 : f32 to vector<8x128xf32>
    %198 = arith.cmpf oge, %196, %197 : vector<8x128xf32>
    %cst_111 = arith.constant 0.000000e+00 : f32
    %199 = vector.broadcast %cst_111 : f32 to vector<8x128xf32>
    %200 = arith.select %198, %199, %196 : vector<8x128xi1>, vector<8x128xf32>
    %201 = arith.extui %198 : vector<8x128xi1> to vector<8x128xi32>
    %202 = arith.sitofp %201 : vector<8x128xi32> to vector<8x128xf32>
    %c1_i32_112 = arith.constant 1 : i32
    %203 = arith.addi %c1_i32_105, %c1_i32_112 : i32
    %204 = arith.index_cast %203 : i32 to index
    %c0_113 = arith.constant 0 : index
    %c0_114 = arith.constant 0 : index
    %205 = vector.load %arg4[%204, %c0_113, %c0_114] : memref<8x8x128xf32, #tpu.memory_space<vmem>>, vector<1x8x128xf32>
    %206 = vector.shape_cast %205 : vector<1x8x128xf32> to vector<8x128xf32>
    %207 = vector.shape_cast %202 : vector<8x128xf32> to vector<1x8x128xf32>
    tpu.vector_store %arg4[%204, %c0_113, %c0_114], %207 {strides = array<i32>} : memref<8x8x128xf32, #tpu.memory_space<vmem>>, vector<1x8x128xf32>,
    %c2_i32_115 = arith.constant 2 : i32
    %cst_116 = arith.constant 7.500000e-01 : f32
    %208 = vector.broadcast %cst_116 : f32 to vector<8x128xf32>
    %209 = arith.mulf %208, %193 : vector<8x128xf32>
    %210 = arith.index_cast %c2_i32_115 : i32 to index
    %c0_117 = arith.constant 0 : index
    %c0_118 = arith.constant 0 : index
    %211 = vector.load %arg5[%210, %c0_117, %c0_118] : memref<8x8x128xf32, #tpu.memory_space<vmem>>, vector<1x8x128xf32>
    %212 = vector.shape_cast %211 : vector<1x8x128xf32> to vector<8x128xf32>
    %213 = arith.addf %209, %212 : vector<8x128xf32>
    %cst_119 = arith.constant 9.687500e-01 : f32
    %214 = vector.broadcast %cst_119 : f32 to vector<8x128xf32>
    %215 = arith.mulf %214, %200 : vector<8x128xf32>
    %216 = arith.addf %215, %213 : vector<8x128xf32>
    %cst_120 = arith.constant 1.250000e+00 : f32
    %217 = vector.broadcast %cst_120 : f32 to vector<8x128xf32>
    %218 = arith.cmpf oge, %216, %217 : vector<8x128xf32>
    %cst_121 = arith.constant 0.000000e+00 : f32
    %219 = vector.broadcast %cst_121 : f32 to vector<8x128xf32>
    %220 = arith.select %218, %219, %216 : vector<8x128xi1>, vector<8x128xf32>
    %221 = arith.extui %218 : vector<8x128xi1> to vector<8x128xi32>
    %222 = arith.sitofp %221 : vector<8x128xi32> to vector<8x128xf32>
    %c1_i32_122 = arith.constant 1 : i32
    %223 = arith.addi %c2_i32_115, %c1_i32_122 : i32
    %224 = arith.index_cast %223 : i32 to index
    %c0_123 = arith.constant 0 : index
    %c0_124 = arith.constant 0 : index
    %225 = vector.load %arg4[%224, %c0_123, %c0_124] : memref<8x8x128xf32, #tpu.memory_space<vmem>>, vector<1x8x128xf32>
    %226 = vector.shape_cast %225 : vector<1x8x128xf32> to vector<8x128xf32>
    %227 = vector.shape_cast %222 : vector<8x128xf32> to vector<1x8x128xf32>
    tpu.vector_store %arg4[%224, %c0_123, %c0_124], %227 {strides = array<i32>} : memref<8x8x128xf32, #tpu.memory_space<vmem>>, vector<1x8x128xf32>,
    %c3_i32_125 = arith.constant 3 : i32
    %cst_126 = arith.constant 7.500000e-01 : f32
    %228 = vector.broadcast %cst_126 : f32 to vector<8x128xf32>
    %229 = arith.mulf %228, %213 : vector<8x128xf32>
    %230 = arith.index_cast %c3_i32_125 : i32 to index
    %c0_127 = arith.constant 0 : index
    %c0_128 = arith.constant 0 : index
    %231 = vector.load %arg5[%230, %c0_127, %c0_128] : memref<8x8x128xf32, #tpu.memory_space<vmem>>, vector<1x8x128xf32>
    %232 = vector.shape_cast %231 : vector<1x8x128xf32> to vector<8x128xf32>
    %233 = arith.addf %229, %232 : vector<8x128xf32>
    %cst_129 = arith.constant 9.687500e-01 : f32
    %234 = vector.broadcast %cst_129 : f32 to vector<8x128xf32>
    %235 = arith.mulf %234, %220 : vector<8x128xf32>
    %236 = arith.addf %235, %233 : vector<8x128xf32>
    %cst_130 = arith.constant 1.250000e+00 : f32
    %237 = vector.broadcast %cst_130 : f32 to vector<8x128xf32>
    %238 = arith.cmpf oge, %236, %237 : vector<8x128xf32>
    %cst_131 = arith.constant 0.000000e+00 : f32
    %239 = vector.broadcast %cst_131 : f32 to vector<8x128xf32>
    %240 = arith.select %238, %239, %236 : vector<8x128xi1>, vector<8x128xf32>
    %241 = arith.extui %238 : vector<8x128xi1> to vector<8x128xi32>
    %242 = arith.sitofp %241 : vector<8x128xi32> to vector<8x128xf32>
    %c1_i32_132 = arith.constant 1 : i32
    %243 = arith.addi %c3_i32_125, %c1_i32_132 : i32
    %244 = arith.index_cast %243 : i32 to index
    %c0_133 = arith.constant 0 : index
    %c0_134 = arith.constant 0 : index
    %245 = vector.load %arg4[%244, %c0_133, %c0_134] : memref<8x8x128xf32, #tpu.memory_space<vmem>>, vector<1x8x128xf32>
    %246 = vector.shape_cast %245 : vector<1x8x128xf32> to vector<8x128xf32>
    %247 = vector.shape_cast %242 : vector<8x128xf32> to vector<1x8x128xf32>
    tpu.vector_store %arg4[%244, %c0_133, %c0_134], %247 {strides = array<i32>} : memref<8x8x128xf32, #tpu.memory_space<vmem>>, vector<1x8x128xf32>,
    %c4_i32_135 = arith.constant 4 : i32
    %cst_136 = arith.constant 7.500000e-01 : f32
    %248 = vector.broadcast %cst_136 : f32 to vector<8x128xf32>
    %249 = arith.mulf %248, %233 : vector<8x128xf32>
    %250 = arith.index_cast %c4_i32_135 : i32 to index
    %c0_137 = arith.constant 0 : index
    %c0_138 = arith.constant 0 : index
    %251 = vector.load %arg5[%250, %c0_137, %c0_138] : memref<8x8x128xf32, #tpu.memory_space<vmem>>, vector<1x8x128xf32>
    %252 = vector.shape_cast %251 : vector<1x8x128xf32> to vector<8x128xf32>
    %253 = arith.addf %249, %252 : vector<8x128xf32>
    %cst_139 = arith.constant 9.687500e-01 : f32
    %254 = vector.broadcast %cst_139 : f32 to vector<8x128xf32>
    %255 = arith.mulf %254, %240 : vector<8x128xf32>
    %256 = arith.addf %255, %253 : vector<8x128xf32>
    %cst_140 = arith.constant 1.250000e+00 : f32
    %257 = vector.broadcast %cst_140 : f32 to vector<8x128xf32>
    %258 = arith.cmpf oge, %256, %257 : vector<8x128xf32>
    %cst_141 = arith.constant 0.000000e+00 : f32
    %259 = vector.broadcast %cst_141 : f32 to vector<8x128xf32>
    %260 = arith.select %258, %259, %256 : vector<8x128xi1>, vector<8x128xf32>
    %261 = arith.extui %258 : vector<8x128xi1> to vector<8x128xi32>
    %262 = arith.sitofp %261 : vector<8x128xi32> to vector<8x128xf32>
    %c1_i32_142 = arith.constant 1 : i32
    %263 = arith.addi %c4_i32_135, %c1_i32_142 : i32
    %264 = arith.index_cast %263 : i32 to index
    %c0_143 = arith.constant 0 : index
    %c0_144 = arith.constant 0 : index
    %265 = vector.load %arg4[%264, %c0_143, %c0_144] : memref<8x8x128xf32, #tpu.memory_space<vmem>>, vector<1x8x128xf32>
    %266 = vector.shape_cast %265 : vector<1x8x128xf32> to vector<8x128xf32>
    %267 = vector.shape_cast %262 : vector<8x128xf32> to vector<1x8x128xf32>
    tpu.vector_store %arg4[%264, %c0_143, %c0_144], %267 {strides = array<i32>} : memref<8x8x128xf32, #tpu.memory_space<vmem>>, vector<1x8x128xf32>,
    %c5_i32_145 = arith.constant 5 : i32
    %cst_146 = arith.constant 7.500000e-01 : f32
    %268 = vector.broadcast %cst_146 : f32 to vector<8x128xf32>
    %269 = arith.mulf %268, %253 : vector<8x128xf32>
    %270 = arith.index_cast %c5_i32_145 : i32 to index
    %c0_147 = arith.constant 0 : index
    %c0_148 = arith.constant 0 : index
    %271 = vector.load %arg5[%270, %c0_147, %c0_148] : memref<8x8x128xf32, #tpu.memory_space<vmem>>, vector<1x8x128xf32>
    %272 = vector.shape_cast %271 : vector<1x8x128xf32> to vector<8x128xf32>
    %273 = arith.addf %269, %272 : vector<8x128xf32>
    %cst_149 = arith.constant 9.687500e-01 : f32
    %274 = vector.broadcast %cst_149 : f32 to vector<8x128xf32>
    %275 = arith.mulf %274, %260 : vector<8x128xf32>
    %276 = arith.addf %275, %273 : vector<8x128xf32>
    %cst_150 = arith.constant 1.250000e+00 : f32
    %277 = vector.broadcast %cst_150 : f32 to vector<8x128xf32>
    %278 = arith.cmpf oge, %276, %277 : vector<8x128xf32>
    %cst_151 = arith.constant 0.000000e+00 : f32
    %279 = vector.broadcast %cst_151 : f32 to vector<8x128xf32>
    %280 = arith.select %278, %279, %276 : vector<8x128xi1>, vector<8x128xf32>
    %281 = arith.extui %278 : vector<8x128xi1> to vector<8x128xi32>
    %282 = arith.sitofp %281 : vector<8x128xi32> to vector<8x128xf32>
    %c1_i32_152 = arith.constant 1 : i32
    %283 = arith.addi %c5_i32_145, %c1_i32_152 : i32
    %284 = arith.index_cast %283 : i32 to index
    %c0_153 = arith.constant 0 : index
    %c0_154 = arith.constant 0 : index
    %285 = vector.load %arg4[%284, %c0_153, %c0_154] : memref<8x8x128xf32, #tpu.memory_space<vmem>>, vector<1x8x128xf32>
    %286 = vector.shape_cast %285 : vector<1x8x128xf32> to vector<8x128xf32>
    %287 = vector.shape_cast %282 : vector<8x128xf32> to vector<1x8x128xf32>
    tpu.vector_store %arg4[%284, %c0_153, %c0_154], %287 {strides = array<i32>} : memref<8x8x128xf32, #tpu.memory_space<vmem>>, vector<1x8x128xf32>,
    %c6_i32_155 = arith.constant 6 : i32
    %cst_156 = arith.constant 7.500000e-01 : f32
    %288 = vector.broadcast %cst_156 : f32 to vector<8x128xf32>
    %289 = arith.mulf %288, %273 : vector<8x128xf32>
    %290 = arith.index_cast %c6_i32_155 : i32 to index
    %c0_157 = arith.constant 0 : index
    %c0_158 = arith.constant 0 : index
    %291 = vector.load %arg5[%290, %c0_157, %c0_158] : memref<8x8x128xf32, #tpu.memory_space<vmem>>, vector<1x8x128xf32>
    %292 = vector.shape_cast %291 : vector<1x8x128xf32> to vector<8x128xf32>
    %293 = arith.addf %289, %292 : vector<8x128xf32>
    %cst_159 = arith.constant 9.687500e-01 : f32
    %294 = vector.broadcast %cst_159 : f32 to vector<8x128xf32>
    %295 = arith.mulf %294, %280 : vector<8x128xf32>
    %296 = arith.addf %295, %293 : vector<8x128xf32>
    %cst_160 = arith.constant 1.250000e+00 : f32
    %297 = vector.broadcast %cst_160 : f32 to vector<8x128xf32>
    %298 = arith.cmpf oge, %296, %297 : vector<8x128xf32>
    %cst_161 = arith.constant 0.000000e+00 : f32
    %299 = vector.broadcast %cst_161 : f32 to vector<8x128xf32>
    %300 = arith.select %298, %299, %296 : vector<8x128xi1>, vector<8x128xf32>
    %301 = arith.extui %298 : vector<8x128xi1> to vector<8x128xi32>
    %302 = arith.sitofp %301 : vector<8x128xi32> to vector<8x128xf32>
    %c1_i32_162 = arith.constant 1 : i32
    %303 = arith.addi %c6_i32_155, %c1_i32_162 : i32
    %304 = arith.index_cast %303 : i32 to index
    %c0_163 = arith.constant 0 : index
    %c0_164 = arith.constant 0 : index
    %305 = vector.load %arg4[%304, %c0_163, %c0_164] : memref<8x8x128xf32, #tpu.memory_space<vmem>>, vector<1x8x128xf32>
    %306 = vector.shape_cast %305 : vector<1x8x128xf32> to vector<8x128xf32>
    %307 = vector.shape_cast %302 : vector<8x128xf32> to vector<1x8x128xf32>
    tpu.vector_store %arg4[%304, %c0_163, %c0_164], %307 {strides = array<i32>} : memref<8x8x128xf32, #tpu.memory_space<vmem>>, vector<1x8x128xf32>,
    %c7_i32_165 = arith.constant 7 : i32
    %c0_166 = arith.constant 0 : index
    %c0_167 = arith.constant 0 : index
    %c0_168 = arith.constant 0 : index
    %308 = vector.load %arg4[%c0_166, %c0_167, %c0_168] : memref<8x8x128xf32, #tpu.memory_space<vmem>>, vector<8x8x128xf32>
    %309 = vector.shape_cast %308 : vector<8x8x128xf32> to vector<64x128xf32>
    %310 = arith.truncf %309 : vector<64x128xf32> to vector<64x128xbf16>
    %c2 = arith.constant 2 : index
    %c0_169 = arith.constant 0 : index
    %c0_170 = arith.constant 0 : index
    %311 = vector.load %arg2[%c2, %c0_169, %c0_170] : memref<3x128x128xbf16, #tpu.memory_space<vmem>>, vector<1x128x128xbf16>
    %312 = vector.shape_cast %311 : vector<1x128x128xbf16> to vector<128x128xbf16>
    %cst_171 = arith.constant dense<0.000000e+00> : vector<64x128xf32>
    %313 = tpu.matmul %310, %312, %cst_171 {dimension_numbers = #tpu.dot_dimension_numbers<[1], [0], [0], [1], [0, 0, 1, 1], [], []>} : vector<64x128xbf16>, vector<128x128xbf16>, vector<64x128xf32> -> vector<64x128xf32>
    %314 = vector.shape_cast %313 : vector<64x128xf32> to vector<8x8x128xf32>
    %c0_172 = arith.constant 0 : index
    %c0_173 = arith.constant 0 : index
    %c0_174 = arith.constant 0 : index
    %315 = vector.load %arg5[%c0_172, %c0_173, %c0_174] : memref<8x8x128xf32, #tpu.memory_space<vmem>>, vector<8x8x128xf32>
    tpu.vector_store %arg5[%c0_172, %c0_173, %c0_174], %314 {strides = array<i32>} : memref<8x8x128xf32, #tpu.memory_space<vmem>>, vector<8x8x128xf32>,
    %cst_175 = arith.constant 0.000000e+00 : f32
    %316 = vector.broadcast %cst_175 : f32 to vector<8x128xf32>
    %c0_176 = arith.constant 0 : index
    %c0_177 = arith.constant 0 : index
    %c0_178 = arith.constant 0 : index
    %317 = vector.load %arg4[%c0_176, %c0_177, %c0_178] : memref<8x8x128xf32, #tpu.memory_space<vmem>>, vector<1x8x128xf32>
    %318 = vector.shape_cast %317 : vector<1x8x128xf32> to vector<8x128xf32>
    %319 = vector.shape_cast %316 : vector<8x128xf32> to vector<1x8x128xf32>
    tpu.vector_store %arg4[%c0_176, %c0_177, %c0_178], %319 {strides = array<i32>} : memref<8x8x128xf32, #tpu.memory_space<vmem>>, vector<1x8x128xf32>,
    %c0_i32_179 = arith.constant 0 : i32
    %cst_180 = arith.constant 7.500000e-01 : f32
    %320 = vector.broadcast %cst_180 : f32 to vector<8x128xf32>
    %321 = arith.mulf %320, %3 : vector<8x128xf32>
    %322 = arith.index_cast %c0_i32_179 : i32 to index
    %c0_181 = arith.constant 0 : index
    %c0_182 = arith.constant 0 : index
    %323 = vector.load %arg5[%322, %c0_181, %c0_182] : memref<8x8x128xf32, #tpu.memory_space<vmem>>, vector<1x8x128xf32>
    %324 = vector.shape_cast %323 : vector<1x8x128xf32> to vector<8x128xf32>
    %325 = arith.addf %321, %324 : vector<8x128xf32>
    %cst_183 = arith.constant 9.687500e-01 : f32
    %326 = vector.broadcast %cst_183 : f32 to vector<8x128xf32>
    %327 = arith.mulf %326, %3 : vector<8x128xf32>
    %328 = arith.addf %327, %325 : vector<8x128xf32>
    %cst_184 = arith.constant 1.250000e+00 : f32
    %329 = vector.broadcast %cst_184 : f32 to vector<8x128xf32>
    %330 = arith.cmpf oge, %328, %329 : vector<8x128xf32>
    %cst_185 = arith.constant 0.000000e+00 : f32
    %331 = vector.broadcast %cst_185 : f32 to vector<8x128xf32>
    %332 = arith.select %330, %331, %328 : vector<8x128xi1>, vector<8x128xf32>
    %333 = arith.extui %330 : vector<8x128xi1> to vector<8x128xi32>
    %334 = arith.sitofp %333 : vector<8x128xi32> to vector<8x128xf32>
    %c1_i32_186 = arith.constant 1 : i32
    %335 = arith.addi %c0_i32_179, %c1_i32_186 : i32
    %336 = arith.index_cast %335 : i32 to index
    %c0_187 = arith.constant 0 : index
    %c0_188 = arith.constant 0 : index
    %337 = vector.load %arg4[%336, %c0_187, %c0_188] : memref<8x8x128xf32, #tpu.memory_space<vmem>>, vector<1x8x128xf32>
    %338 = vector.shape_cast %337 : vector<1x8x128xf32> to vector<8x128xf32>
    %339 = vector.shape_cast %334 : vector<8x128xf32> to vector<1x8x128xf32>
    tpu.vector_store %arg4[%336, %c0_187, %c0_188], %339 {strides = array<i32>} : memref<8x8x128xf32, #tpu.memory_space<vmem>>, vector<1x8x128xf32>,
    %c1_i32_189 = arith.constant 1 : i32
    %cst_190 = arith.constant 7.500000e-01 : f32
    %340 = vector.broadcast %cst_190 : f32 to vector<8x128xf32>
    %341 = arith.mulf %340, %325 : vector<8x128xf32>
    %342 = arith.index_cast %c1_i32_189 : i32 to index
    %c0_191 = arith.constant 0 : index
    %c0_192 = arith.constant 0 : index
    %343 = vector.load %arg5[%342, %c0_191, %c0_192] : memref<8x8x128xf32, #tpu.memory_space<vmem>>, vector<1x8x128xf32>
    %344 = vector.shape_cast %343 : vector<1x8x128xf32> to vector<8x128xf32>
    %345 = arith.addf %341, %344 : vector<8x128xf32>
    %cst_193 = arith.constant 9.687500e-01 : f32
    %346 = vector.broadcast %cst_193 : f32 to vector<8x128xf32>
    %347 = arith.mulf %346, %332 : vector<8x128xf32>
    %348 = arith.addf %347, %345 : vector<8x128xf32>
    %cst_194 = arith.constant 1.250000e+00 : f32
    %349 = vector.broadcast %cst_194 : f32 to vector<8x128xf32>
    %350 = arith.cmpf oge, %348, %349 : vector<8x128xf32>
    %cst_195 = arith.constant 0.000000e+00 : f32
    %351 = vector.broadcast %cst_195 : f32 to vector<8x128xf32>
    %352 = arith.select %350, %351, %348 : vector<8x128xi1>, vector<8x128xf32>
    %353 = arith.extui %350 : vector<8x128xi1> to vector<8x128xi32>
    %354 = arith.sitofp %353 : vector<8x128xi32> to vector<8x128xf32>
    %c1_i32_196 = arith.constant 1 : i32
    %355 = arith.addi %c1_i32_189, %c1_i32_196 : i32
    %356 = arith.index_cast %355 : i32 to index
    %c0_197 = arith.constant 0 : index
    %c0_198 = arith.constant 0 : index
    %357 = vector.load %arg4[%356, %c0_197, %c0_198] : memref<8x8x128xf32, #tpu.memory_space<vmem>>, vector<1x8x128xf32>
    %358 = vector.shape_cast %357 : vector<1x8x128xf32> to vector<8x128xf32>
    %359 = vector.shape_cast %354 : vector<8x128xf32> to vector<1x8x128xf32>
    tpu.vector_store %arg4[%356, %c0_197, %c0_198], %359 {strides = array<i32>} : memref<8x8x128xf32, #tpu.memory_space<vmem>>, vector<1x8x128xf32>,
    %c2_i32_199 = arith.constant 2 : i32
    %cst_200 = arith.constant 7.500000e-01 : f32
    %360 = vector.broadcast %cst_200 : f32 to vector<8x128xf32>
    %361 = arith.mulf %360, %345 : vector<8x128xf32>
    %362 = arith.index_cast %c2_i32_199 : i32 to index
    %c0_201 = arith.constant 0 : index
    %c0_202 = arith.constant 0 : index
    %363 = vector.load %arg5[%362, %c0_201, %c0_202] : memref<8x8x128xf32, #tpu.memory_space<vmem>>, vector<1x8x128xf32>
    %364 = vector.shape_cast %363 : vector<1x8x128xf32> to vector<8x128xf32>
    %365 = arith.addf %361, %364 : vector<8x128xf32>
    %cst_203 = arith.constant 9.687500e-01 : f32
    %366 = vector.broadcast %cst_203 : f32 to vector<8x128xf32>
    %367 = arith.mulf %366, %352 : vector<8x128xf32>
    %368 = arith.addf %367, %365 : vector<8x128xf32>
    %cst_204 = arith.constant 1.250000e+00 : f32
    %369 = vector.broadcast %cst_204 : f32 to vector<8x128xf32>
    %370 = arith.cmpf oge, %368, %369 : vector<8x128xf32>
    %cst_205 = arith.constant 0.000000e+00 : f32
    %371 = vector.broadcast %cst_205 : f32 to vector<8x128xf32>
    %372 = arith.select %370, %371, %368 : vector<8x128xi1>, vector<8x128xf32>
    %373 = arith.extui %370 : vector<8x128xi1> to vector<8x128xi32>
    %374 = arith.sitofp %373 : vector<8x128xi32> to vector<8x128xf32>
    %c1_i32_206 = arith.constant 1 : i32
    %375 = arith.addi %c2_i32_199, %c1_i32_206 : i32
    %376 = arith.index_cast %375 : i32 to index
    %c0_207 = arith.constant 0 : index
    %c0_208 = arith.constant 0 : index
    %377 = vector.load %arg4[%376, %c0_207, %c0_208] : memref<8x8x128xf32, #tpu.memory_space<vmem>>, vector<1x8x128xf32>
    %378 = vector.shape_cast %377 : vector<1x8x128xf32> to vector<8x128xf32>
    %379 = vector.shape_cast %374 : vector<8x128xf32> to vector<1x8x128xf32>
    tpu.vector_store %arg4[%376, %c0_207, %c0_208], %379 {strides = array<i32>} : memref<8x8x128xf32, #tpu.memory_space<vmem>>, vector<1x8x128xf32>,
    %c3_i32_209 = arith.constant 3 : i32
    %cst_210 = arith.constant 7.500000e-01 : f32
    %380 = vector.broadcast %cst_210 : f32 to vector<8x128xf32>
    %381 = arith.mulf %380, %365 : vector<8x128xf32>
    %382 = arith.index_cast %c3_i32_209 : i32 to index
    %c0_211 = arith.constant 0 : index
    %c0_212 = arith.constant 0 : index
    %383 = vector.load %arg5[%382, %c0_211, %c0_212] : memref<8x8x128xf32, #tpu.memory_space<vmem>>, vector<1x8x128xf32>
    %384 = vector.shape_cast %383 : vector<1x8x128xf32> to vector<8x128xf32>
    %385 = arith.addf %381, %384 : vector<8x128xf32>
    %cst_213 = arith.constant 9.687500e-01 : f32
    %386 = vector.broadcast %cst_213 : f32 to vector<8x128xf32>
    %387 = arith.mulf %386, %372 : vector<8x128xf32>
    %388 = arith.addf %387, %385 : vector<8x128xf32>
    %cst_214 = arith.constant 1.250000e+00 : f32
    %389 = vector.broadcast %cst_214 : f32 to vector<8x128xf32>
    %390 = arith.cmpf oge, %388, %389 : vector<8x128xf32>
    %cst_215 = arith.constant 0.000000e+00 : f32
    %391 = vector.broadcast %cst_215 : f32 to vector<8x128xf32>
    %392 = arith.select %390, %391, %388 : vector<8x128xi1>, vector<8x128xf32>
    %393 = arith.extui %390 : vector<8x128xi1> to vector<8x128xi32>
    %394 = arith.sitofp %393 : vector<8x128xi32> to vector<8x128xf32>
    %c1_i32_216 = arith.constant 1 : i32
    %395 = arith.addi %c3_i32_209, %c1_i32_216 : i32
    %396 = arith.index_cast %395 : i32 to index
    %c0_217 = arith.constant 0 : index
    %c0_218 = arith.constant 0 : index
    %397 = vector.load %arg4[%396, %c0_217, %c0_218] : memref<8x8x128xf32, #tpu.memory_space<vmem>>, vector<1x8x128xf32>
    %398 = vector.shape_cast %397 : vector<1x8x128xf32> to vector<8x128xf32>
    %399 = vector.shape_cast %394 : vector<8x128xf32> to vector<1x8x128xf32>
    tpu.vector_store %arg4[%396, %c0_217, %c0_218], %399 {strides = array<i32>} : memref<8x8x128xf32, #tpu.memory_space<vmem>>, vector<1x8x128xf32>,
    %c4_i32_219 = arith.constant 4 : i32
    %cst_220 = arith.constant 7.500000e-01 : f32
    %400 = vector.broadcast %cst_220 : f32 to vector<8x128xf32>
    %401 = arith.mulf %400, %385 : vector<8x128xf32>
    %402 = arith.index_cast %c4_i32_219 : i32 to index
    %c0_221 = arith.constant 0 : index
    %c0_222 = arith.constant 0 : index
    %403 = vector.load %arg5[%402, %c0_221, %c0_222] : memref<8x8x128xf32, #tpu.memory_space<vmem>>, vector<1x8x128xf32>
    %404 = vector.shape_cast %403 : vector<1x8x128xf32> to vector<8x128xf32>
    %405 = arith.addf %401, %404 : vector<8x128xf32>
    %cst_223 = arith.constant 9.687500e-01 : f32
    %406 = vector.broadcast %cst_223 : f32 to vector<8x128xf32>
    %407 = arith.mulf %406, %392 : vector<8x128xf32>
    %408 = arith.addf %407, %405 : vector<8x128xf32>
    %cst_224 = arith.constant 1.250000e+00 : f32
    %409 = vector.broadcast %cst_224 : f32 to vector<8x128xf32>
    %410 = arith.cmpf oge, %408, %409 : vector<8x128xf32>
    %cst_225 = arith.constant 0.000000e+00 : f32
    %411 = vector.broadcast %cst_225 : f32 to vector<8x128xf32>
    %412 = arith.select %410, %411, %408 : vector<8x128xi1>, vector<8x128xf32>
    %413 = arith.extui %410 : vector<8x128xi1> to vector<8x128xi32>
    %414 = arith.sitofp %413 : vector<8x128xi32> to vector<8x128xf32>
    %c1_i32_226 = arith.constant 1 : i32
    %415 = arith.addi %c4_i32_219, %c1_i32_226 : i32
    %416 = arith.index_cast %415 : i32 to index
    %c0_227 = arith.constant 0 : index
    %c0_228 = arith.constant 0 : index
    %417 = vector.load %arg4[%416, %c0_227, %c0_228] : memref<8x8x128xf32, #tpu.memory_space<vmem>>, vector<1x8x128xf32>
    %418 = vector.shape_cast %417 : vector<1x8x128xf32> to vector<8x128xf32>
    %419 = vector.shape_cast %414 : vector<8x128xf32> to vector<1x8x128xf32>
    tpu.vector_store %arg4[%416, %c0_227, %c0_228], %419 {strides = array<i32>} : memref<8x8x128xf32, #tpu.memory_space<vmem>>, vector<1x8x128xf32>,
    %c5_i32_229 = arith.constant 5 : i32
    %cst_230 = arith.constant 7.500000e-01 : f32
    %420 = vector.broadcast %cst_230 : f32 to vector<8x128xf32>
    %421 = arith.mulf %420, %405 : vector<8x128xf32>
    %422 = arith.index_cast %c5_i32_229 : i32 to index
    %c0_231 = arith.constant 0 : index
    %c0_232 = arith.constant 0 : index
    %423 = vector.load %arg5[%422, %c0_231, %c0_232] : memref<8x8x128xf32, #tpu.memory_space<vmem>>, vector<1x8x128xf32>
    %424 = vector.shape_cast %423 : vector<1x8x128xf32> to vector<8x128xf32>
    %425 = arith.addf %421, %424 : vector<8x128xf32>
    %cst_233 = arith.constant 9.687500e-01 : f32
    %426 = vector.broadcast %cst_233 : f32 to vector<8x128xf32>
    %427 = arith.mulf %426, %412 : vector<8x128xf32>
    %428 = arith.addf %427, %425 : vector<8x128xf32>
    %cst_234 = arith.constant 1.250000e+00 : f32
    %429 = vector.broadcast %cst_234 : f32 to vector<8x128xf32>
    %430 = arith.cmpf oge, %428, %429 : vector<8x128xf32>
    %cst_235 = arith.constant 0.000000e+00 : f32
    %431 = vector.broadcast %cst_235 : f32 to vector<8x128xf32>
    %432 = arith.select %430, %431, %428 : vector<8x128xi1>, vector<8x128xf32>
    %433 = arith.extui %430 : vector<8x128xi1> to vector<8x128xi32>
    %434 = arith.sitofp %433 : vector<8x128xi32> to vector<8x128xf32>
    %c1_i32_236 = arith.constant 1 : i32
    %435 = arith.addi %c5_i32_229, %c1_i32_236 : i32
    %436 = arith.index_cast %435 : i32 to index
    %c0_237 = arith.constant 0 : index
    %c0_238 = arith.constant 0 : index
    %437 = vector.load %arg4[%436, %c0_237, %c0_238] : memref<8x8x128xf32, #tpu.memory_space<vmem>>, vector<1x8x128xf32>
    %438 = vector.shape_cast %437 : vector<1x8x128xf32> to vector<8x128xf32>
    %439 = vector.shape_cast %434 : vector<8x128xf32> to vector<1x8x128xf32>
    tpu.vector_store %arg4[%436, %c0_237, %c0_238], %439 {strides = array<i32>} : memref<8x8x128xf32, #tpu.memory_space<vmem>>, vector<1x8x128xf32>,
    %c6_i32_239 = arith.constant 6 : i32
    %cst_240 = arith.constant 7.500000e-01 : f32
    %440 = vector.broadcast %cst_240 : f32 to vector<8x128xf32>
    %441 = arith.mulf %440, %425 : vector<8x128xf32>
    %442 = arith.index_cast %c6_i32_239 : i32 to index
    %c0_241 = arith.constant 0 : index
    %c0_242 = arith.constant 0 : index
    %443 = vector.load %arg5[%442, %c0_241, %c0_242] : memref<8x8x128xf32, #tpu.memory_space<vmem>>, vector<1x8x128xf32>
    %444 = vector.shape_cast %443 : vector<1x8x128xf32> to vector<8x128xf32>
    %445 = arith.addf %441, %444 : vector<8x128xf32>
    %cst_243 = arith.constant 9.687500e-01 : f32
    %446 = vector.broadcast %cst_243 : f32 to vector<8x128xf32>
    %447 = arith.mulf %446, %432 : vector<8x128xf32>
    %448 = arith.addf %447, %445 : vector<8x128xf32>
    %cst_244 = arith.constant 1.250000e+00 : f32
    %449 = vector.broadcast %cst_244 : f32 to vector<8x128xf32>
    %450 = arith.cmpf oge, %448, %449 : vector<8x128xf32>
    %cst_245 = arith.constant 0.000000e+00 : f32
    %451 = vector.broadcast %cst_245 : f32 to vector<8x128xf32>
    %452 = arith.select %450, %451, %448 : vector<8x128xi1>, vector<8x128xf32>
    %453 = arith.extui %450 : vector<8x128xi1> to vector<8x128xi32>
    %454 = arith.sitofp %453 : vector<8x128xi32> to vector<8x128xf32>
    %c1_i32_246 = arith.constant 1 : i32
    %455 = arith.addi %c6_i32_239, %c1_i32_246 : i32
    %456 = arith.index_cast %455 : i32 to index
    %c0_247 = arith.constant 0 : index
    %c0_248 = arith.constant 0 : index
    %457 = vector.load %arg4[%456, %c0_247, %c0_248] : memref<8x8x128xf32, #tpu.memory_space<vmem>>, vector<1x8x128xf32>
    %458 = vector.shape_cast %457 : vector<1x8x128xf32> to vector<8x128xf32>
    %459 = vector.shape_cast %454 : vector<8x128xf32> to vector<1x8x128xf32>
    tpu.vector_store %arg4[%456, %c0_247, %c0_248], %459 {strides = array<i32>} : memref<8x8x128xf32, #tpu.memory_space<vmem>>, vector<1x8x128xf32>,
    %c7_i32_249 = arith.constant 7 : i32
    %c0_250 = arith.constant 0 : index
    %c0_251 = arith.constant 0 : index
    %c0_252 = arith.constant 0 : index
    %460 = vector.load %arg4[%c0_250, %c0_251, %c0_252] : memref<8x8x128xf32, #tpu.memory_space<vmem>>, vector<8x8x128xf32>
    %461 = arith.truncf %460 : vector<8x8x128xf32> to vector<8x8x128xbf16>
    %c0_253 = arith.constant 0 : index
    %c0_254 = arith.constant 0 : index
    %c0_255 = arith.constant 0 : index
    %462 = vector.load %arg3[%c0_253, %c0_254, %c0_255] : memref<8x8x128xbf16, #tpu.memory_space<vmem>>, vector<8x8x128xbf16>
    tpu.vector_store %arg3[%c0_253, %c0_254, %c0_255], %461 {strides = array<i32>} : memref<8x8x128xbf16, #tpu.memory_space<vmem>>, vector<8x8x128xbf16>,
    return
  }
  func.func @transform_0(%arg0: i32) -> (i32, i32, i32) {
    %c0_i32 = arith.constant 0 : i32
    %c0_i32_0 = arith.constant 0 : i32
    %c0_i32_1 = arith.constant 0 : i32
    return %c0_i32, %arg0, %c0_i32_0 : i32, i32, i32
  }
  func.func @transform_1(%arg0: i32) -> (i32, i32, i32) {
    %c0_i32 = arith.constant 0 : i32
    %c0_i32_0 = arith.constant 0 : i32
    %c0_i32_1 = arith.constant 0 : i32
    %c0_i32_2 = arith.constant 0 : i32
    return %c0_i32, %c0_i32_0, %c0_i32_1 : i32, i32, i32
  }
  func.func @transform_2(%arg0: i32) -> (i32, i32, i32) {
    %c0_i32 = arith.constant 0 : i32
    %c0_i32_0 = arith.constant 0 : i32
    %c0_i32_1 = arith.constant 0 : i32
    return %c0_i32, %arg0, %c0_i32_0 : i32, i32, i32
  }
}

</mosaic_0001>

<bundles_post_ra>
// kernel: tpu_custom_call.1
= control target key start
LH: loop header
LB: loop body
LE: loop exit
PB: predicated region body
PF: predicated region fallthrough
CT: control target
= control target key end

     0   :  { %7 = vsyncpa [#allocation5], 0  ;;  %s1197_s0 = inlined_call_operand.hbm [shape: bf16[8,8,128], index: 0, kind: input, shape index: {}]   ;;  %s1198_s1 = inlined_call_operand.hbm [shape: bf16[3,128,128], index: 1, kind: input, shape index: {}]   ;;  %s1199_s2 = inlined_call_operand.hbm [shape: bf16[8,8,128], index: 2, kind: output, shape index: {}]  }
   0x1   :  { %8 = vsyncpa [#allocation8], 0 }
   0x2   :  { %9 = vsyncpa [#allocation6], 0  ;;  %s1107_s9 = smov [#allocation4]   ;;  %s1035_s13 = scalar_lea.hbm %s1197_s0, 512 }
   0x3   :  { %s15_s10 = sshll.u32 %s1107_s9, 4  ;;  %p1036_p0 = scmp.ne.s32.totalorder %s1197_s0, %s1035_s13  ;;  %s16_s10 = int_to_ptr.vmem [resolvable:$true] %s15_s10 }
   0x4   :  { %p1039_p1 = scmp.lt.u32.totalorder %s1035_s13, %s1197_s0 }
   0x6   :  { %p1041_p2 = pnand %p1039_p1, %p1036_p0 }
   0x8   :  { %1044 = shalt.err (!%p1041_p2)
}
   0x9   :  { %s1045_s18 = scalar_lea.vmem %s16_s10, 512  ;;  %p1050_p4 = scmp.lt.s32.totalorder %s16_s10, %s16_s10 }
   0xa   :  { %p1046_p3 = scmp.ne.s32.totalorder %s16_s10, %s1045_s18  ;;  %p1051_p5 = scmp.lt.s32.totalorder %s1045_s18, %s1045_s18 }
   0xc   :  { %p1052_p6 = por %p1051_p5, %p1050_p4 }
   0xe   :  { %p1053_p7 = pnand %p1052_p6, %p1046_p3 }
  0x10   :  { %1056 = shalt.err (!%p1053_p7)
}
  0x11   :  { %s1108_s19 = smov 64   ;;  %s1109_s20 = smov 4  }
  0x12   :  { %21 = dma.hbm_to_vmem [thread:$0]  %s1197_s0, 512, %s16_s10, [#allocation5], %s1108_s19, %s1108_s19, %s1109_s20  }
  0x13   :  { %s1110_s23 = smov [#allocation7]   ;;  %s1057_s27 = scalar_lea.hbm %s1198_s1, 3072 }
  0x14   :  { %s27_s24 = sshll.u32 %s1110_s23, 4  ;;  %p1058_p8 = scmp.ne.s32.totalorder %s1198_s1, %s1057_s27  ;;  %s28_s24 = int_to_ptr.vmem [resolvable:$true] %s27_s24 }
  0x15   :  { %p1061_p9 = scmp.lt.u32.totalorder %s1057_s27, %s1198_s1 }
  0x17   :  { %p1063_p10 = pnand %p1061_p9, %p1058_p8 }
  0x19   :  { %1066 = shalt.err (!%p1063_p10)
}
  0x1a   :  { %s1067_s4 = scalar_lea.vmem %s28_s24, 3072  ;;  %p1072_p12 = scmp.lt.s32.totalorder %s28_s24, %s28_s24 }
  0x1b   :  { %p1068_p11 = scmp.ne.s32.totalorder %s28_s24, %s1067_s4  ;;  %p1073_p13 = scmp.lt.s32.totalorder %s1067_s4, %s1067_s4 }
  0x1d   :  { %p1074_p0 = por %p1073_p13, %p1072_p12 }
  0x1f   :  { %p1075_p1 = pnand %p1074_p0, %p1068_p11 }
  0x21   :  { %1078 = shalt.err (!%p1075_p1)
}
  0x22   :  { %33 = dma.hbm_to_vmem [thread:$0]  %s1198_s1, 3072, %s28_s24, [#allocation8], %s1108_s19, %s1108_s19, %s1109_s20  }
  0x23   :  { %1101 = dma.done.wait [#allocation5], 512  }
  0x24   :  { %1102 = vsyncadd [#allocation5], 4294966784 }
  0x25   :  { %1103 = dma.done.wait [#allocation8], 3072  }
  0x26   :  { %1104 = vsyncadd [#allocation8], 4294964224  ;;  %v1011_v0 = vld [vmem:[#allocation7] sm:$0xff]   ;;  %v1012_v1 = vld [vmem:[#allocation7 + $0x8] sm:$0xff]   ;;  %v1111_v25 = vmov 1.0   ;;  %v1112_v26 = vmov 0.0  }
  0x27   :  { %914 = vmatprep.subr.bf16.mxu0 %v1011_v0  ;;  %v1013_v2 = vld [vmem:[#allocation7 + $0x10] sm:$0xff]   ;;  %v1014_v3 = vld [vmem:[#allocation7 + $0x18] sm:$0xff]   ;;  %v819_v4 = vld [vmem:[#allocation4] sm:$0xff]   ;;  %v1162_v27 = vpack.c.bf16 %v1111_v25, %v1112_v26  ;;  %vm1113_vm1 = vmmov 1   ;;  %v1114_v51 = vmov 1.0|1.0  }
  0x28   :  { %915 = vmatpush3.bf16.msra.mxu0 %v1011_v0  ;;  %930 = vmatprep.mubr.bf16.mxu0 %v819_v4  ;;  %v1019_v5 = vld [vmem:[#allocation7 + $0x40] sm:$0xff]   ;;  %v1020_v6 = vld [vmem:[#allocation7 + $0x48] sm:$0xff]   ;;  %v1021_v8 = vld [vmem:[#allocation7 + $0x50] sm:$0xff]   ;;  %s1115_s1 = smov [#allocation9]  }
  0x29   :  { %916 = vmatprep.subr.bf16.mxu0 %v1012_v1  ;;  %v1015_v7 = vld [vmem:[#allocation7 + $0x20] sm:$0xff]   ;;  %938 = vmatprep.subr.bf16.mxu1 %v1019_v5  ;;  %v1016_v9 = vld [vmem:[#allocation7 + $0x28] sm:$0xff]   ;;  %v1022_v10 = vld [vmem:[#allocation7 + $0x58] sm:$0xff]   ;;  %s760_s6 = sshll.u32 %s1115_s1, 4  ;;  %s761_s6 = int_to_ptr.vmem [resolvable:$true] %s760_s6 }
  0x2a   :  { %939 = vmatpush3.bf16.msra.mxu1 %v1019_v5  ;;  %v1017_v11 = vld [vmem:[#allocation7 + $0x30] sm:$0xff]   ;;  %v1018_v12 = vld [vmem:[#allocation7 + $0x38] sm:$0xff]   ;;  %v854_v13 = vld [vmem:[#allocation4 + $0x8] sm:$0xff]   ;;  %s1079_s7 = scalar_lea.vmem %s761_s6, 512  ;;  %p1084_p3 = scmp.lt.s32.totalorder %s761_s6, %s761_s6 }
  0x2b   :  { %940 = vmatprep.subr.bf16.mxu1 %v1020_v6  ;;  %v855_v14 = vld [vmem:[#allocation4 + $0x10] sm:$0xff]   ;;  %v856_v15 = vld [vmem:[#allocation4 + $0x18] sm:$0xff]   ;;  %v1023_v16 = vld [vmem:[#allocation7 + $0x60] sm:$0xff]   ;;  %p1080_p2 = scmp.ne.s32.totalorder %s761_s6, %s1079_s7  ;;  %p1085_p4 = scmp.lt.s32.totalorder %s1079_s7, %s1079_s7 }
  0x2c   :  { %917 = vmatpush3.bf16.msra.mxu0 %v1012_v1  ;;  %v1024_v17 = vld [vmem:[#allocation7 + $0x68] sm:$0xff]   ;;  %v1025_v18 = vld [vmem:[#allocation7 + $0x70] sm:$0xff]   ;;  %v1026_v19 = vld [vmem:[#allocation7 + $0x78] sm:$0xff]  }
  0x2d   :  { %918 = vmatprep.subr.bf16.mxu0 %v1013_v2  ;;  %v1027_v20 = vld [vmem:[#allocation7 + $0x80] sm:$0xff]   ;;  %v1028_v21 = vld [vmem:[#allocation7 + $0x88] sm:$0xff]   ;;  %v1029_v22 = vld [vmem:[#allocation7 + $0x90] sm:$0xff]   ;;  %p1086_p5 = por %p1085_p4, %p1084_p3 }
  0x2e   :  { %941 = vmatpush3.bf16.msra.mxu1 %v1020_v6  ;;  %v1030_v23 = vld [vmem:[#allocation7 + $0x98] sm:$0xff]   ;;  %v1033_v4 = vld [vmem:[#allocation7 + $0xb0] sm:$0xff]  }
  0x2f   :  { %942 = vmatprep.subr.bf16.mxu1 %v1021_v8  ;;  %v1034_v5 = vld [vmem:[#allocation7 + $0xb8] sm:$0xff]   ;;  %p1087_p6 = pnand %p1086_p5, %p1080_p2 }
  0x30   :  { %919 = vmatpush3.bf16.msra.mxu0 %v1013_v2  ;;  %v1031_v2 = vld [vmem:[#allocation7 + $0xa0] sm:$0xff]  }
  0x31   :  { %920 = vmatprep.subr.bf16.mxu0 %v1014_v3 }
  0x32   :  { %943 = vmatpush3.bf16.msra.mxu1 %v1021_v8 }
  0x33   :  { %944 = vmatprep.subr.bf16.mxu1 %v1022_v10 }
  0x34   :  { %921 = vmatpush3.bf16.msra.mxu0 %v1014_v3  ;;  %v1032_v3 = vld [vmem:[#allocation7 + $0xa8] sm:$0xff]  }
  0x35   :  { %922 = vmatprep.subr.bf16.mxu0 %v1015_v7 }
  0x36   :  { %945 = vmatpush3.bf16.msra.mxu1 %v1022_v10 }
  0x37   :  { %946 = vmatprep.subr.bf16.mxu1 %v1023_v16 }
  0x38   :  { %923 = vmatpush3.bf16.msra.mxu0 %v1015_v7 }
  0x39   :  { %924 = vmatprep.subr.bf16.mxu0 %v1016_v9 }
  0x3a   :  { %947 = vmatpush3.bf16.msra.mxu1 %v1023_v16 }
  0x3b   :  { %948 = vmatprep.subr.bf16.mxu1 %v1024_v17 }
  0x3c   :  { %925 = vmatpush3.bf16.msra.mxu0 %v1016_v9 }
  0x3d   :  { %926 = vmatprep.subr.bf16.mxu0 %v1017_v11 }
  0x3e   :  { %949 = vmatpush3.bf16.msra.mxu1 %v1024_v17 }
  0x3f   :  { %950 = vmatprep.subr.bf16.mxu1 %v1025_v18 }
  0x40   :  { %927 = vmatpush3.bf16.msra.mxu0 %v1017_v11 }
  0x41   :  { %928 = vmatprep.subr.bf16.mxu0 %v1018_v12 }
  0x42   :  { %951 = vmatpush3.bf16.msra.mxu1 %v1025_v18 }
  0x43   :  { %952 = vmatprep.subr.bf16.mxu1 %v1026_v19 }
  0x44   :  { %929 = vmatpush3.bf16.msra.mxu0 %v1018_v12 }
  0x45   :  { %962 = vmatprep.subr.bf16.mxu0 %v1027_v20 }
  0x46   :  { %953 = vmatpush3.bf16.msra.mxu1 %v1026_v19 }
  0x47   :  { %931 = vmatmul.mubr.bf16.vlgmr.msra.gmra.mrb[0].mxu0 %v854_v13  ;;  %986 = vmatprep.subr.bf16.mxu1 %v1027_v20 }
  0x48   :  { %934 = vmatprep.mubr.bf16.mxu0 %v855_v14  ;;  %963 = vmatpush3.bf16.msra.mxu0 %v1027_v20 }
  0x49   :  { %964 = vmatprep.subr.bf16.mxu0 %v1028_v21 }
  0x4c   :  { %965 = vmatpush3.bf16.msra.mxu0 %v1028_v21 }
  0x4d   :  { %966 = vmatprep.subr.bf16.mxu0 %v1029_v22 }
  0x4f   :  { %935 = vmatmul.mubr.bf16.gmra.mrb[4].mxu0 %v856_v15 }
  0x50   :  { %967 = vmatpush3.bf16.msra.mxu0 %v1029_v22 }
  0x51   :  { %968 = vmatprep.subr.bf16.mxu0 %v1030_v23 }
  0x54   :  { %969 = vmatpush3.bf16.msra.mxu0 %v1030_v23 }
  0x55   :  { %970 = vmatprep.subr.bf16.mxu0 %v1031_v2 }
  0x58   :  { %971 = vmatpush3.bf16.msra.mxu0 %v1031_v2 }
  0x59   :  { %972 = vmatprep.subr.bf16.mxu0 %v1032_v3 }
  0x5c   :  { %973 = vmatpush3.bf16.msra.mxu0 %v1032_v3 }
  0x5d   :  { %974 = vmatprep.subr.bf16.mxu0 %v1033_v4 }
  0x60   :  { %975 = vmatpush3.bf16.msra.mxu0 %v1033_v4 }
  0x61   :  { %976 = vmatprep.subr.bf16.mxu0 %v1034_v5 }
  0x64   :  { %977 = vmatpush3.bf16.msra.mxu0 %v1034_v5 }
 0x11a   :  { %v932_v24 = vpop.f32.mrb[0].mxu0 }
 0x11b   :  { %v175_v28 = vpop.f32.mrb[1].mxu0 }
 0x11c   :  { %v933_v29 = vpop.f32.mrb[2].mxu0  ;;  %v224_v30 = vmul.f32 0.75, %v175_v28  ;;  %vm218_vm0 = vcmp.ge.f32.partialorder %v175_v28, 1.25 }
 0x11d   :  { %v178_v31 = vpop.f32.mrb[3].mxu0  ;;  %v219_v32 = vsel %vm218_vm0, 0.0, %v175_v28  ;;  %vm860_vm2 = vmpackc.low %vm218_vm0, %vm1113_vm1 }
 0x11e   :  { %v227_v33 = vadd.f32 %v224_v30, %v178_v31  ;;  %v228_v34 = vmul.f32 0.96875, %v219_v32  ;;  %954 = vmatprep.mubr.msk.bf16.mxu1 %vm860_vm2, %v1162_v27 }
 0x120   :  { %v236_v35 = vmul.f32 0.75, %v227_v33  ;;  %v229_v36 = vadd.f32 %v228_v34, %v227_v33 }
 0x122   :  { %v239_v37 = vadd.f32 %v932_v24, %v236_v35  ;;  %vm230_vm3 = vcmp.ge.f32.partialorder %v229_v36, 1.25  ;;  %v936_v38 = vpop.f32.mrb[4].mxu0 }
 0x123   :  { %v231_v39 = vsel %vm230_vm3, 0.0, %v229_v36  ;;  %v191_v40 = vpop.f32.mrb[5].mxu0 }
 0x124   :  { %v240_v41 = vmul.f32 0.96875, %v231_v39  ;;  %v248_v42 = vmul.f32 0.75, %v239_v37  ;;  %v937_v43 = vpop.f32.mrb[6].mxu0 }
 0x125   :  { %v194_v44 = vpop.f32.mrb[7].mxu0 }
 0x126   :  { %v241_v45 = vadd.f32 %v240_v41, %v239_v37  ;;  %v251_v46 = vadd.f32 %v933_v29, %v248_v42 }
 0x128   :  { %vm242_vm4 = vcmp.ge.f32.partialorder %v241_v45, 1.25  ;;  %v260_v47 = vmul.f32 0.75, %v251_v46 }
 0x129   :  { %v243_v48 = vsel %vm242_vm4, 0.0, %v241_v45  ;;  %vm863_vm5 = vmpackc.low %vm242_vm4, %vm230_vm3 }
 0x12a   :  { %v252_v49 = vmul.f32 0.96875, %v243_v48  ;;  %v263_v50 = vadd.f32 %v260_v47, %v191_v40  ;;  %955 = vmatmul.mubr.msk.bf16.vlgmr.msra.gmra.mrb[0].mxu1 %vm863_vm5, %v1114_v51 }
 0x12b   :  { %994 = vmatpush3.bf16.msra.mxu1 %v1027_v20 }
 0x12c   :  { %v253_v52 = vadd.f32 %v252_v49, %v251_v46  ;;  %v272_v53 = vmul.f32 0.75, %v263_v50  ;;  %987 = vmatprep.subr.bf16.mxu1 %v1028_v21 }
 0x12e   :  { %vm254_vm6 = vcmp.ge.f32.partialorder %v253_v52, 1.25  ;;  %v275_v54 = vadd.f32 %v272_v53, %v194_v44 }
 0x12f   :  { %v255_v55 = vsel %vm254_vm6, 0.0, %v253_v52  ;;  %995 = vmatpush3.bf16.msra.mxu1 %v1028_v21 }
 0x130   :  { %v264_v56 = vmul.f32 0.96875, %v255_v55  ;;  %v284_v57 = vmul.f32 0.75, %v275_v54  ;;  %988 = vmatprep.subr.bf16.mxu1 %v1029_v22 }
 0x132   :  { %v265_v58 = vadd.f32 %v264_v56, %v263_v50  ;;  %v287_v59 = vadd.f32 %v936_v38, %v284_v57 }
 0x133   :  { %996 = vmatpush3.bf16.msra.mxu1 %v1029_v22 }
 0x134   :  { %vm266_vm7 = vcmp.ge.f32.partialorder %v265_v58, 1.25  ;;  %989 = vmatprep.subr.bf16.mxu1 %v1030_v23 }
 0x135   :  { %v267_v60 = vsel %vm266_vm7, 0.0, %v265_v58  ;;  %vm865_vm8 = vmpackc.low %vm266_vm7, %vm254_vm6 }
 0x136   :  { %v276_v61 = vmul.f32 0.96875, %v267_v60  ;;  %958 = vmatprep.mubr.msk.bf16.mxu1 %vm865_vm8, %v1114_v51 }
 0x137   :  { %997 = vmatpush3.bf16.msra.mxu1 %v1030_v23 }
 0x138   :  { %v277_v62 = vadd.f32 %v276_v61, %v275_v54  ;;  %990 = vmatprep.subr.bf16.mxu1 %v1031_v2 }
 0x13a   :  { %vm278_vm9 = vcmp.ge.f32.partialorder %v277_v62, 1.25 }
 0x13b   :  { %v279_v63 = vsel %vm278_vm9, 0.0, %v277_v62  ;;  %998 = vmatpush3.bf16.msra.mxu1 %v1031_v2 }
 0x13c   :  { %v288_v0 = vmul.f32 0.96875, %v279_v63  ;;  %991 = vmatprep.subr.bf16.mxu1 %v1032_v3 }
 0x13e   :  { %v289_v1 = vadd.f32 %v288_v0, %v287_v59 }
 0x13f   :  { %999 = vmatpush3.bf16.msra.mxu1 %v1032_v3 }
 0x140   :  { %vm290_vm10 = vcmp.ge.f32.partialorder %v289_v1, 1.25  ;;  %992 = vmatprep.subr.bf16.mxu1 %v1033_v4 }
 0x141   :  { %vm867_vm11 = vmpackc.low %vm290_vm10, %vm278_vm9 }
 0x142   :  { %959 = vmatmul.mubr.msk.bf16.gmra.mrb[4].mxu1 %vm867_vm11, %v1114_v51 }
 0x143   :  { %1000 = vmatpush3.bf16.msra.mxu1 %v1033_v4 }
 0x144   :  { %993 = vmatprep.subr.bf16.mxu1 %v1034_v5 }
 0x147   :  { %1001 = vmatpush3.bf16.msra.mxu1 %v1034_v5 }
 0x1fd   :  { %v956_v6 = vpop.f32.mrb[0].mxu1 }
 0x1fe   :  { %v406_v7 = vpop.f32.mrb[1].mxu1 }
 0x1ff   :  { %vm449_vm12 = vcmp.ge.f32.partialorder %v406_v7, 1.25  ;;  %v957_v8 = vpop.f32.mrb[2].mxu1  ;;  %v454_v9 = vmul.f32 0.75, %v406_v7 }
 0x200   :  { %v450_v10 = vsel %vm449_vm12, 0.0, %v406_v7  ;;  %v409_v11 = vpop.f32.mrb[3].mxu1  ;;  %vm869_vm13 = vmpackc.low %vm449_vm12, %vm1113_vm1 }
 0x201   :  { %v457_v12 = vmul.f32 0.96875, %v450_v10  ;;  %v456_v13 = vadd.f32 %v454_v9, %v409_v11  ;;  %978 = vmatprep.mubr.msk.bf16.mxu0 %vm869_vm13, %v1162_v27 }
 0x203   :  { %v458_v14 = vadd.f32 %v457_v12, %v456_v13  ;;  %v464_v15 = vmul.f32 0.75, %v456_v13 }
 0x205   :  { %vm459_vm14 = vcmp.ge.f32.partialorder %v458_v14, 1.25  ;;  %v466_v16 = vadd.f32 %v956_v6, %v464_v15 }
 0x206   :  { %v460_v17 = vsel %vm459_vm14, 0.0, %v458_v14 }
 0x207   :  { %v467_v18 = vmul.f32 0.96875, %v460_v17  ;;  %v474_v19 = vmul.f32 0.75, %v466_v16 }
 0x209   :  { %v468_v20 = vadd.f32 %v467_v18, %v466_v16  ;;  %v476_v21 = vadd.f32 %v957_v8, %v474_v19 }
 0x20b   :  { %vm469_vm15 = vcmp.ge.f32.partialorder %v468_v20, 1.25  ;;  %v484_v27 = vmul.f32 0.75, %v476_v21 }
 0x20c   :  { %v470_v22 = vsel %vm469_vm15, 0.0, %v468_v20  ;;  %vm872_vm0 = vmpackc.low %vm469_vm15, %vm459_vm14 }
 0x20d   :  { %v477_v23 = vmul.f32 0.96875, %v470_v22  ;;  %979 = vmatmul.mubr.msk.bf16.vlgmr.msra.gmra.mrb[8].mxu0 %vm872_vm0, %v1114_v51 }
 0x20f   :  { %v478_v24 = vadd.f32 %v477_v23, %v476_v21 }
 0x211   :  { %vm479_vm1 = vcmp.ge.f32.partialorder %v478_v24, 1.25 }
 0x212   :  { %v480_v25 = vsel %vm479_vm1, 0.0, %v478_v24 }
 0x213   :  { %v487_v31 = vmul.f32 0.96875, %v480_v25 }
 0x215   :  { %v960_v28 = vpop.f32.mrb[4].mxu1 }
 0x216   :  { %v422_v29 = vpop.f32.mrb[5].mxu1 }
 0x217   :  { %v486_v30 = vadd.f32 %v484_v27, %v422_v29  ;;  %v961_v32 = vpop.f32.mrb[6].mxu1 }
 0x218   :  { %v425_v33 = vpop.f32.mrb[7].mxu1 }
 0x219   :  { %v488_v34 = vadd.f32 %v487_v31, %v486_v30  ;;  %v494_v35 = vmul.f32 0.75, %v486_v30 }
 0x21b   :  { %vm489_vm2 = vcmp.ge.f32.partialorder %v488_v34, 1.25  ;;  %v496_v36 = vadd.f32 %v494_v35, %v425_v33 }
 0x21c   :  { %v490_v37 = vsel %vm489_vm2, 0.0, %v488_v34  ;;  %vm874_vm3 = vmpackc.low %vm489_vm2, %vm479_vm1 }
 0x21d   :  { %v497_v38 = vmul.f32 0.96875, %v490_v37  ;;  %v504_v39 = vmul.f32 0.75, %v496_v36  ;;  %982 = vmatprep.mubr.msk.bf16.mxu1 %vm874_vm3, %v1114_v51 }
 0x21f   :  { %v498_v40 = vadd.f32 %v497_v38, %v496_v36  ;;  %v506_v41 = vadd.f32 %v960_v28, %v504_v39 }
 0x221   :  { %vm499_vm4 = vcmp.ge.f32.partialorder %v498_v40, 1.25 }
 0x222   :  { %v500_v42 = vsel %vm499_vm4, 0.0, %v498_v40 }
 0x223   :  { %v507_v43 = vmul.f32 0.96875, %v500_v42 }
 0x225   :  { %v508_v44 = vadd.f32 %v507_v43, %v506_v41 }
 0x227   :  { %vm509_vm5 = vcmp.ge.f32.partialorder %v508_v44, 1.25 }
 0x228   :  { %vm876_vm6 = vmpackc.low %vm509_vm5, %vm499_vm4 }
 0x229   :  { %983 = vmatmul.mubr.msk.bf16.vlgmr.msra.gmra.mrb[8].mxu1 %vm876_vm6, %v1114_v51 }
 0x2e0   :  { %v980_v45 = vpop.f32.mrb[8].mxu0 }
 0x2e1   :  { %v624_v46 = vpop.f32.mrb[9].mxu0 }
 0x2e2   :  { %vm667_vm7 = vcmp.ge.f32.partialorder %v624_v46, 1.25  ;;  %v981_v47 = vpop.f32.mrb[10].mxu0  ;;  %v672_v48 = vmul.f32 0.75, %v624_v46 }
 0x2e3   :  { %v668_v49 = vsel %vm667_vm7, 0.0, %v624_v46  ;;  %v811_v50 = vsel %vm667_vm7, 1.0, %v1112_v26  ;;  %v627_v52 = vpop.f32.mrb[11].mxu0 }
 0x2e4   :  { %v675_v53 = vmul.f32 0.96875, %v668_v49  ;;  %v837_v54 = vpack.c.bf16 %v811_v50, %v1112_v26  ;;  %v674_v55 = vadd.f32 %v672_v48, %v627_v52 }
 0x2e6   :  { %838 = vst [vmem:[#allocation9] sm:$0xff] %v837_v54   ;;  %v676_v56 = vadd.f32 %v675_v53, %v674_v55  ;;  %v682_v57 = vmul.f32 0.75, %v674_v55 }
 0x2e8   :  { %vm677_vm8 = vcmp.ge.f32.partialorder %v676_v56, 1.25  ;;  %v684_v58 = vadd.f32 %v980_v45, %v682_v57 }
 0x2e9   :  { %v678_v59 = vsel %vm677_vm8, 0.0, %v676_v56  ;;  %v812_v63 = vsel %vm677_vm8, 1.0, %v1112_v26 }
 0x2ea   :  { %v685_v51 = vmul.f32 0.96875, %v678_v59  ;;  %v692_v60 = vmul.f32 0.75, %v684_v58 }
 0x2ec   :  { %v686_v61 = vadd.f32 %v685_v51, %v684_v58  ;;  %v694_v62 = vadd.f32 %v981_v47, %v692_v60 }
 0x2ee   :  { %vm687_vm9 = vcmp.ge.f32.partialorder %v686_v61, 1.25  ;;  %v702_v7 = vmul.f32 0.75, %v694_v62 }
 0x2ef   :  { %v688_v0 = vsel %vm687_vm9, 0.0, %v686_v61  ;;  %v813_v1 = vsel %vm687_vm9, 1.0, %v1112_v26 }
 0x2f0   :  { %v842_v2 = vpack.c.bf16 %v813_v1, %v812_v63  ;;  %v695_v3 = vmul.f32 0.96875, %v688_v0 }
 0x2f2   :  { %857 = vst [vmem:[#allocation9 + $0x8] sm:$0xff] %v842_v2   ;;  %v696_v4 = vadd.f32 %v695_v3, %v694_v62 }
 0x2f4   :  { %vm697_vm10 = vcmp.ge.f32.partialorder %v696_v4, 1.25 }
 0x2f5   :  { %v698_v5 = vsel %vm697_vm10, 0.0, %v696_v4  ;;  %v814_v16 = vsel %vm697_vm10, 1.0, %v1112_v26 }
 0x2f6   :  { %v705_v10 = vmul.f32 0.96875, %v698_v5 }
 0x2fc   :  { %v984_v6 = vpop.f32.mrb[8].mxu1 }
 0x2fd   :  { %v640_v8 = vpop.f32.mrb[9].mxu1 }
 0x2fe   :  { %v704_v9 = vadd.f32 %v702_v7, %v640_v8  ;;  %v985_v11 = vpop.f32.mrb[10].mxu1 }
 0x2ff   :  { %v643_v12 = vpop.f32.mrb[11].mxu1 }
 0x300   :  { %v706_v13 = vadd.f32 %v705_v10, %v704_v9  ;;  %v712_v14 = vmul.f32 0.75, %v704_v9 }
 0x302   :  { %vm707_vm11 = vcmp.ge.f32.partialorder %v706_v13, 1.25  ;;  %v714_v15 = vadd.f32 %v712_v14, %v643_v12 }
 0x303   :  { %v708_v17 = vsel %vm707_vm11, 0.0, %v706_v13  ;;  %v815_v18 = vsel %vm707_vm11, 1.0, %v1112_v26 }
 0x304   :  { %v847_v19 = vpack.c.bf16 %v815_v18, %v814_v16  ;;  %v715_v20 = vmul.f32 0.96875, %v708_v17  ;;  %v722_v21 = vmul.f32 0.75, %v714_v15 }
 0x306   :  { %858 = vst [vmem:[#allocation9 + $0x10] sm:$0xff] %v847_v19   ;;  %v716_v22 = vadd.f32 %v715_v20, %v714_v15  ;;  %v724_v23 = vadd.f32 %v984_v6, %v722_v21 }
 0x308   :  { %vm717_vm12 = vcmp.ge.f32.partialorder %v716_v22, 1.25 }
 0x309   :  { %v718_v24 = vsel %vm717_vm12, 0.0, %v716_v22  ;;  %v816_v27 = vsel %vm717_vm12, 1.0, %v1112_v26 }
 0x30a   :  { %v725_v25 = vmul.f32 0.96875, %v718_v24 }
 0x30c   :  { %v726_v28 = vadd.f32 %v725_v25, %v724_v23 }
 0x30e   :  { %vm727_vm13 = vcmp.ge.f32.partialorder %v726_v28, 1.25 }
 0x30f   :  { %v817_v29 = vsel %vm727_vm13, 1.0, %v1112_v26 }
 0x310   :  { %v852_v30 = vpack.c.bf16 %v817_v29, %v816_v27 }
 0x312   :  { %859 = vst [vmem:[#allocation9 + $0x18] sm:$0xff] %v852_v30  }
 0x313   :  { %1090 = shalt.err (!%p1087_p6)
}
 0x314   :  { %s1091_s10 = scalar_lea.hbm %s1199_s2, 512 }
 0x315   :  { %p1092_p7 = scmp.ne.s32.totalorder %s1199_s2, %s1091_s10  ;;  %p1095_p8 = scmp.lt.u32.totalorder %s1091_s10, %s1199_s2 }
 0x317   :  { %p1097_p9 = pnand %p1095_p8, %p1092_p7 }
 0x319   :  { %1100 = shalt.err (!%p1097_p9)
}
 0x31a   :  { %766 = dma.vmem_to_hbm [thread:$0]  %s761_s6, 512, %s1199_s2, [#allocation6], %s1108_s19, %s1108_s19, %s1109_s20  }
 0x31b   :  { %1105 = dma.done.wait [#allocation6], 512  }
 0x31c   :  { %1106 = vsyncadd [#allocation6], 4294966784 }
 0x31d   :  { %770 = vsyncpa [#allocation5], 1 }
 0x31e   :  { %771 = vsyncpa [#allocation8], 1 }
 0x31f   :  { %772 = vsyncpa [#allocation6], 1 }

</bundles_post_ra>
